<compile_context>
chip_gen: v5e
topology: v5e:2x2
jax: 0.10.0
libtpu: 0.0.40
codegen_flags: <defaults>
</compile_context>

<pallas_src>
from functools import partial

import numpy as np
import jax
import jax.numpy as jnp
from jax import lax
from jax.experimental import pallas as pl
from jax.experimental.pallas import tpu as pltpu

LANES = 128          # lane width of a vreg row
ROW_STRIP = 64       # batch rows processed per inner-loop strip (bounds live vregs)


def _round_up(x, m):
    return ((x + m - 1) // m) * m


def _roll_lanes(v, shift):
    shift = shift % LANES
    if shift == 0:
        return v
    return pltpu.roll(v, shift=shift, axis=1)


def _layer_plan(L0, K, P, lpc):
    """Static geometry of the strided lane lattice for ONE sample.

    Returns (conv_geo, pool_geo, n_feat, s_final, extent):
      conv_geo[i] = (L_out, stride) for conv layer i (2*lpc layers total)
      pool_geo[p] = (L_in, L_out, stride) for pooling p (2 poolings)
      extent      = number of lanes a single sample ever reads or writes
                    (including ceil-mode pool window reads), i.e. the minimal
                    per-sample pitch so side-by-side packed samples on one
                    128-lane row can never contaminate each other.
    """
    conv_geo, pool_geo = [], []
    L, s = L0, 1
    extent = L0
    for _ in range(2):
        for _ in range(lpc):
            L = L + K - 1
            conv_geo.append((L, s))
            extent = max(extent, (L - 1) * s + 1)
        Lp = -(-L // P)                                   # ceil_mode=True
        pool_geo.append((L, Lp, s))
        extent = max(extent, (Lp * P - 1) * s + 1)        # ceil-mode window reads
        s, L = s * P, Lp
    return conv_geo, pool_geo, L, s, extent


def make_kernel(K, P, lpc, n_strips, rs, n_pack, conv_geo, pool_geo):
    two_lpc = 2 * lpc
    n_w = two_lpc * K          # scal_ref[:n_w] = conv taps, scal_ref[n_w] = fc bias

    def kernel(x_ref, tab_ref, fcw_ref, scal_ref, o_ref):
        fc_bias = scal_ref[n_w]                            # SMEM scalar

        def strip(i, carry):
            r = pl.multiple_of(i * rs, rs)
            b = x_ref[pl.ds(r, rs), :]                     # (rs, 128) f32
            li = 0
            for phase in range(2):
                for _ in range(lpc):
                    _, s = conv_geo[li]
                    # Conv1d(padding=K-1, bias=False) on the strided lattice:
                    #   y[t] = sum_k w[k] * x[t + k - (K-1)]  ->  right lane-rolls.
                    # Off-lattice / guard-gap lanes of b are exactly 0, so reads
                    # past a sample's data behave like the PyTorch zero padding.
                    y = scal_ref[li * K + (K - 1)] * b     # tap k = K-1 (shift 0)
                    for k in range(K - 1):
                        y = y + scal_ref[li * K + k] * _roll_lanes(
                            b, (K - 1 - k) * s)
                    # Pre-masked bias (zero off-lattice) + ReLU: gap lanes stay 0,
                    # which is what keeps packed samples independent.
                    b = jnp.maximum(y + tab_ref[pl.ds(li, 1), :], 0.0)
                    li += 1
                # MaxPool1d(P, stride=P, ceil_mode=True).  Activations are
                # post-ReLU (>= 0) so the zeros already in gap lanes act as -inf.
                _, _, s = pool_geo[phase]
                m = b
                for p in range(1, P):
                    m = jnp.maximum(m, _roll_lanes(b, -p * s))
                if phase == 0:
                    # keep only the surviving (coarser) lattice lanes
                    b = m * tab_ref[pl.ds(two_lpc, 1), :]
                else:
                    b = m      # fc weights are zero off-lattice; no mask needed
            # Flatten + Linear: fc weights pre-scattered onto each packed
            # sample's final lattice -> one multiply + lane reduction per slot,
            # written as a lane-dense (rs, n_pack) strip (4 B per sample).
            cols = []
            for c in range(n_pack):
                cols.append(jnp.sum(b * fcw_ref[pl.ds(c, 1), :],
                                    axis=1, keepdims=True))
            logits = cols[0] if n_pack == 1 else jnp.concatenate(cols, axis=1)
            o_ref[pl.ds(r, rs), :] = logits + fc_bias
            return carry

        lax.fori_loop(0, n_strips, strip, 0, unroll=n_strips <= 4)

    return kernel


@partial(jax.jit, static_argnames=("K", "P", "lpc", "block_rows"))
def edcnn_forward(x, conv_w, conv_b, fc_w, fc_b, *, K=3, P=2, lpc=4,
                  block_rows=2048):
    """x: (B, 1, L0) float32 -> (B, 1) float32, matching the PyTorch forward.

    conv_w: (2*lpc, K) conv taps (the module's (1,1,K) weights, squeezed),
    conv_b: (2*lpc,) per-layer scalar biases, fc_w: (1, feat), fc_b: (1,).
    """
    B, C, L0 = x.shape
    assert C == 1, "module is only shape-consistent for in/out channels == 1"
    # TODO(synk): output_dim > 1 would just need more fc rows / output columns.
    assert fc_w.shape[0] == 1, "kernel assumes output_dim == 1 (module default)"

    conv_geo, pool_geo, n_feat, s_final, extent = _layer_plan(L0, K, P, lpc)
    assert fc_w.shape[-1] == n_feat
    assert extent <= LANES, (
        f"one sample needs {extent} lanes > {LANES}; reduce input_dim/num_layers")

    # ---- static sample-packing geometry: n_pack samples per 128-lane row ----
    n_pack = LANES // extent                  # >= 1
    pitch = LANES // n_pack                   # per-sample lane pitch (>= extent)

    rows = max(1, -(-B // n_pack))            # packed rows of n_pack samples
    rs = ROW_STRIP
    # Tile heuristic: cap at block_rows (VMEM), aim for ~8 grid steps on large
    # batches (v7x: 2 TensorCores), keep tiles >= ~0.5 MiB, never exceed batch.
    bt = min(_round_up(block_rows, rs),
             max(_round_up(-(-rows // 8), rs), 1024),
             _round_up(rows, rs))
    rows_pad = _round_up(rows, bt)
    b_pack = rows_pad * n_pack

    # ---- pack the batch: n_pack samples side by side on every 128-lane row --
    x2 = x[:, 0, :].astype(jnp.float32)
    xp = jnp.pad(x2, ((0, b_pack - B), (0, pitch - L0)))
    xrow = xp.reshape(rows_pad, n_pack * pitch)
    if n_pack * pitch < LANES:
        xrow = jnp.pad(xrow, ((0, 0), (0, LANES - n_pack * pitch)))

    # ---- static 0/1 lattice masks (numpy) -> per-layer masked biases --------
    offs = np.arange(n_pack) * pitch
    conv_mask = np.zeros((2 * lpc, LANES), np.float32)
    for li, (L, s) in enumerate(conv_geo):
        lanes = (offs[:, None] + np.arange(L)[None, :] * s).reshape(-1)
        conv_mask[li, lanes] = 1.0
    Lp0 = pool_geo[0][1]
    s_after0 = pool_geo[0][2] * P
    pool0_mask = np.zeros((LANES,), np.float32)
    pool0_mask[(offs[:, None] + np.arange(Lp0)[None, :] * s_after0).reshape(-1)] = 1.0
    mbias = conv_b.astype(jnp.float32).reshape(2 * lpc, 1) * jnp.asarray(conv_mask)
    tab = jnp.concatenate([mbias, jnp.asarray(pool0_mask)[None, :]], axis=0)

    # ---- fc weights scattered onto each packed sample's final lattice -------
    scat = np.zeros((n_feat, n_pack, LANES), np.float32)
    for c in range(n_pack):
        scat[np.arange(n_feat), c, offs[c] + np.arange(n_feat) * s_final] = 1.0
    fcw = jnp.einsum("f,fcl->cl", fc_w[0].astype(jnp.float32), jnp.asarray(scat))

    # ---- conv taps + fc bias as SMEM scalars ---------------------------------
    scal = jnp.concatenate([conv_w.astype(jnp.float32).reshape(-1),
                            fc_b.astype(jnp.float32).reshape(-1)[:1]])

    grid = (rows_pad // bt,)
    kernel = make_kernel(K, P, lpc, bt // rs, rs, n_pack, conv_geo, pool_geo)
    out = pl.pallas_call(
        kernel,
        out_shape=jax.ShapeDtypeStruct((rows_pad, n_pack), jnp.float32),
        grid=grid,
        in_specs=[
            pl.BlockSpec((bt, LANES), lambda i: (i, 0)),            # packed inputs
            pl.BlockSpec((2 * lpc + 1, LANES), lambda i: (0, 0)),   # masked biases + pool mask
            pl.BlockSpec((n_pack, LANES), lambda i: (0, 0)),        # scattered fc weights
            pl.BlockSpec(memory_space=pltpu.MemorySpace.SMEM),      # conv taps + fc bias
        ],
        out_specs=pl.BlockSpec((bt, n_pack), lambda i: (i, 0)),
        compiler_params=pltpu.CompilerParams(
            dimension_semantics=("parallel",)),
    )(xrow, tab, fcw, scal)

    # row-major unpack: sample index == row * n_pack + slot
    return out.reshape(rows_pad * n_pack)[:B].reshape(B, 1)


def ref_forward(x2d, conv_w, conv_b, fc_w, fc_b, K, P, lpc):
    """Pure-numpy reference mirroring the PyTorch module semantics."""
    b = np.asarray(x2d, np.float32)
    for phase in range(2):
        for layer in range(lpc):
            w = conv_w[phase * lpc + layer]
            L_in = b.shape[1]
            L_out = L_in + K - 1
            xp = np.pad(b, ((0, 0), (K - 1, K - 1)))
            y = np.zeros((b.shape[0], L_out), np.float32)
            for k in range(K):
                y += w[k] * xp[:, k:k + L_out]
            b = np.maximum(y + conv_b[phase * lpc + layer], 0.0)
        L = b.shape[1]
        Lp = -(-L // P)
        bp = np.pad(b, ((0, 0), (0, Lp * P - L)), constant_values=-np.inf)
        b = bp.reshape(b.shape[0], Lp, P).max(axis=2)
    return b @ np.asarray(fc_w).T + np.asarray(fc_b)


if __name__ == "__main__":
    # Module hyper-parameters (defaults except input_dim, chosen small but with
    # an odd length after the first conv stack so ceil_mode pooling is hit).
    B = 2
    input_dim = 15
    num_layers = 8
    K = 3
    P = 2
    lpc = num_layers // 2
    bias_value = 0.001
    output_dim = 1

    # feature_length exactly as computed in the module's __init__
    feat = input_dim
    for _ in range(2):
        feat += (K - 1) * lpc
        feat = int(np.ceil(feat / P))

    key = jax.random.PRNGKey(0)
    k1, k2, k3, k4, k5 = jax.random.split(key, 5)
    x = jax.random.normal(k1, (B, 1, input_dim), jnp.float32)
    conv_w = jax.random.normal(k2, (num_layers, K), jnp.float32) * 0.5  # (1,1,K) squeezed
    conv_b = jnp.full((num_layers,), bias_value, jnp.float32)           # Variable scalars
    fc_w = jax.random.normal(k3, (output_dim, feat), jnp.float32) * 0.3
    fc_b = jax.random.normal(k4, (output_dim,), jnp.float32) * 0.1

    out = jax.block_until_ready(
        edcnn_forward(x, conv_w, conv_b, fc_w, fc_b, K=K, P=P, lpc=lpc))
    ref = ref_forward(np.array(x[:, 0, :]), np.array(conv_w), np.array(conv_b),
                      np.array(fc_w), np.array(fc_b), K, P, lpc)
    assert out.shape == (B, output_dim)
    assert np.allclose(np.array(out), ref, rtol=1e-4, atol=1e-4), (np.array(out), ref)

    # Larger batch with a small tile: exercises sample packing, the multi-strip
    # inner loop and a multi-step "parallel" batch grid (pipelining path).
    Bbig = 1000
    xb = jax.random.normal(k5, (Bbig, 1, input_dim), jnp.float32)
    outb = jax.block_until_ready(
        edcnn_forward(xb, conv_w, conv_b, fc_w, fc_b, K=K, P=P, lpc=lpc,
                      block_rows=128))
    refb = ref_forward(np.array(xb[:, 0, :]), np.array(conv_w), np.array(conv_b),
                       np.array(fc_w), np.array(fc_b), K, P, lpc)
    assert outb.shape == (Bbig, output_dim)
    assert np.allclose(np.array(outb), refb, rtol=1e-4, atol=1e-4)

    print("KERNEL_OK")
</pallas_src>

<mosaic_0001>
module attributes {stable_mosaic.version = 11 : i64} {
  func.func @kernel(%arg0: i32, %arg1: memref<64x128xf32, #tpu.memory_space<vmem>>, %arg2: memref<9x128xf32, #tpu.memory_space<vmem>>, %arg3: memref<3x128xf32, #tpu.memory_space<vmem>>, %arg4: memref<25xf32, #tpu.memory_space<smem>>, %arg5: memref<64x3xf32, #tpu.memory_space<vmem>>) attributes {dimension_semantics = [#tpu.dimension_semantics<parallel>], iteration_bounds = array<i64: 1>, scalar_prefetch = 0 : i64, scratch_operands = 0 : i64, tpu.core_type = #tpu.core_type<tc>, window_params = [{transform_indices = @transform_0, window_bounds = array<i64: 64, 128>}, {pipeline_mode = #tpu.pipeline_mode<synchronous>, transform_indices = @transform_1, window_bounds = array<i64: 9, 128>}, {pipeline_mode = #tpu.pipeline_mode<synchronous>, transform_indices = @transform_2, window_bounds = array<i64: 3, 128>}, {transform_indices = @transform_3, window_bounds = array<i64: 25>}, {transform_indices = @transform_4, window_bounds = array<i64: 64, 3>}]} {
    %c24 = arith.constant 24 : index
    %0 = memref.load %arg4[%c24] : memref<25xf32, #tpu.memory_space<smem>>
    %c0_i32 = arith.constant 0 : i32
    %c64_i32 = arith.constant 64 : i32
    %1 = arith.muli %c0_i32, %c64_i32 : i32
    %2 = tpu.assume_multiple %1, 64 : i32
    %3 = arith.index_cast %2 : i32 to index
    %c0 = arith.constant 0 : index
    %4 = vector.load %arg1[%3, %c0] : memref<64x128xf32, #tpu.memory_space<vmem>>, vector<64x128xf32>
    %c2 = arith.constant 2 : index
    %5 = memref.load %arg4[%c2] : memref<25xf32, #tpu.memory_space<smem>>
    %6 = vector.broadcast %5 : f32 to vector<64x128xf32>
    %7 = arith.mulf %6, %4 : vector<64x128xf32>
    %c0_0 = arith.constant 0 : index
    %8 = memref.load %arg4[%c0_0] : memref<25xf32, #tpu.memory_space<smem>>
    %c2_i32 = arith.constant 2 : i32
    %9 = tpu.dynamic_rotate %4 by %c2_i32 dim 1 : vector<64x128xf32>, i32 -> vector<64x128xf32>
    %10 = vector.broadcast %8 : f32 to vector<64x128xf32>
    %11 = arith.mulf %10, %9 : vector<64x128xf32>
    %12 = arith.addf %7, %11 : vector<64x128xf32>
    %c1 = arith.constant 1 : index
    %13 = memref.load %arg4[%c1] : memref<25xf32, #tpu.memory_space<smem>>
    %c1_i32 = arith.constant 1 : i32
    %14 = tpu.dynamic_rotate %4 by %c1_i32 dim 1 : vector<64x128xf32>, i32 -> vector<64x128xf32>
    %15 = vector.broadcast %13 : f32 to vector<64x128xf32>
    %16 = arith.mulf %15, %14 : vector<64x128xf32>
    %17 = arith.addf %12, %16 : vector<64x128xf32>
    %c0_1 = arith.constant 0 : index
    %c0_2 = arith.constant 0 : index
    %18 = vector.load %arg2[%c0_1, %c0_2] : memref<9x128xf32, #tpu.memory_space<vmem>>, vector<1x128xf32>
    %19 = vector.broadcast %18 : vector<1x128xf32> to vector<64x128xf32>
    %20 = arith.addf %17, %19 : vector<64x128xf32>
    %cst = arith.constant 0.000000e+00 : f32
    %21 = vector.broadcast %cst : f32 to vector<64x128xf32>
    %22 = arith.maximumf %20, %21 : vector<64x128xf32>
    %c5 = arith.constant 5 : index
    %23 = memref.load %arg4[%c5] : memref<25xf32, #tpu.memory_space<smem>>
    %24 = vector.broadcast %23 : f32 to vector<64x128xf32>
    %25 = arith.mulf %24, %22 : vector<64x128xf32>
    %c3 = arith.constant 3 : index
    %26 = memref.load %arg4[%c3] : memref<25xf32, #tpu.memory_space<smem>>
    %c2_i32_3 = arith.constant 2 : i32
    %27 = tpu.dynamic_rotate %22 by %c2_i32_3 dim 1 : vector<64x128xf32>, i32 -> vector<64x128xf32>
    %28 = vector.broadcast %26 : f32 to vector<64x128xf32>
    %29 = arith.mulf %28, %27 : vector<64x128xf32>
    %30 = arith.addf %25, %29 : vector<64x128xf32>
    %c4 = arith.constant 4 : index
    %31 = memref.load %arg4[%c4] : memref<25xf32, #tpu.memory_space<smem>>
    %c1_i32_4 = arith.constant 1 : i32
    %32 = tpu.dynamic_rotate %22 by %c1_i32_4 dim 1 : vector<64x128xf32>, i32 -> vector<64x128xf32>
    %33 = vector.broadcast %31 : f32 to vector<64x128xf32>
    %34 = arith.mulf %33, %32 : vector<64x128xf32>
    %35 = arith.addf %30, %34 : vector<64x128xf32>
    %c1_5 = arith.constant 1 : index
    %c0_6 = arith.constant 0 : index
    %36 = vector.load %arg2[%c1_5, %c0_6] : memref<9x128xf32, #tpu.memory_space<vmem>>, vector<1x128xf32>
    %37 = vector.broadcast %36 : vector<1x128xf32> to vector<64x128xf32>
    %38 = arith.addf %35, %37 : vector<64x128xf32>
    %cst_7 = arith.constant 0.000000e+00 : f32
    %39 = vector.broadcast %cst_7 : f32 to vector<64x128xf32>
    %40 = arith.maximumf %38, %39 : vector<64x128xf32>
    %c8 = arith.constant 8 : index
    %41 = memref.load %arg4[%c8] : memref<25xf32, #tpu.memory_space<smem>>
    %42 = vector.broadcast %41 : f32 to vector<64x128xf32>
    %43 = arith.mulf %42, %40 : vector<64x128xf32>
    %c6 = arith.constant 6 : index
    %44 = memref.load %arg4[%c6] : memref<25xf32, #tpu.memory_space<smem>>
    %c2_i32_8 = arith.constant 2 : i32
    %45 = tpu.dynamic_rotate %40 by %c2_i32_8 dim 1 : vector<64x128xf32>, i32 -> vector<64x128xf32>
    %46 = vector.broadcast %44 : f32 to vector<64x128xf32>
    %47 = arith.mulf %46, %45 : vector<64x128xf32>
    %48 = arith.addf %43, %47 : vector<64x128xf32>
    %c7 = arith.constant 7 : index
    %49 = memref.load %arg4[%c7] : memref<25xf32, #tpu.memory_space<smem>>
    %c1_i32_9 = arith.constant 1 : i32
    %50 = tpu.dynamic_rotate %40 by %c1_i32_9 dim 1 : vector<64x128xf32>, i32 -> vector<64x128xf32>
    %51 = vector.broadcast %49 : f32 to vector<64x128xf32>
    %52 = arith.mulf %51, %50 : vector<64x128xf32>
    %53 = arith.addf %48, %52 : vector<64x128xf32>
    %c2_10 = arith.constant 2 : index
    %c0_11 = arith.constant 0 : index
    %54 = vector.load %arg2[%c2_10, %c0_11] : memref<9x128xf32, #tpu.memory_space<vmem>>, vector<1x128xf32>
    %55 = vector.broadcast %54 : vector<1x128xf32> to vector<64x128xf32>
    %56 = arith.addf %53, %55 : vector<64x128xf32>
    %cst_12 = arith.constant 0.000000e+00 : f32
    %57 = vector.broadcast %cst_12 : f32 to vector<64x128xf32>
    %58 = arith.maximumf %56, %57 : vector<64x128xf32>
    %c11 = arith.constant 11 : index
    %59 = memref.load %arg4[%c11] : memref<25xf32, #tpu.memory_space<smem>>
    %60 = vector.broadcast %59 : f32 to vector<64x128xf32>
    %61 = arith.mulf %60, %58 : vector<64x128xf32>
    %c9 = arith.constant 9 : index
    %62 = memref.load %arg4[%c9] : memref<25xf32, #tpu.memory_space<smem>>
    %c2_i32_13 = arith.constant 2 : i32
    %63 = tpu.dynamic_rotate %58 by %c2_i32_13 dim 1 : vector<64x128xf32>, i32 -> vector<64x128xf32>
    %64 = vector.broadcast %62 : f32 to vector<64x128xf32>
    %65 = arith.mulf %64, %63 : vector<64x128xf32>
    %66 = arith.addf %61, %65 : vector<64x128xf32>
    %c10 = arith.constant 10 : index
    %67 = memref.load %arg4[%c10] : memref<25xf32, #tpu.memory_space<smem>>
    %c1_i32_14 = arith.constant 1 : i32
    %68 = tpu.dynamic_rotate %58 by %c1_i32_14 dim 1 : vector<64x128xf32>, i32 -> vector<64x128xf32>
    %69 = vector.broadcast %67 : f32 to vector<64x128xf32>
    %70 = arith.mulf %69, %68 : vector<64x128xf32>
    %71 = arith.addf %66, %70 : vector<64x128xf32>
    %c3_15 = arith.constant 3 : index
    %c0_16 = arith.constant 0 : index
    %72 = vector.load %arg2[%c3_15, %c0_16] : memref<9x128xf32, #tpu.memory_space<vmem>>, vector<1x128xf32>
    %73 = vector.broadcast %72 : vector<1x128xf32> to vector<64x128xf32>
    %74 = arith.addf %71, %73 : vector<64x128xf32>
    %cst_17 = arith.constant 0.000000e+00 : f32
    %75 = vector.broadcast %cst_17 : f32 to vector<64x128xf32>
    %76 = arith.maximumf %74, %75 : vector<64x128xf32>
    %c127_i32 = arith.constant 127 : i32
    %77 = tpu.dynamic_rotate %76 by %c127_i32 dim 1 : vector<64x128xf32>, i32 -> vector<64x128xf32>
    %78 = arith.maximumf %76, %77 : vector<64x128xf32>
    %c8_18 = arith.constant 8 : index
    %c0_19 = arith.constant 0 : index
    %79 = vector.load %arg2[%c8_18, %c0_19] : memref<9x128xf32, #tpu.memory_space<vmem>>, vector<1x128xf32>
    %80 = vector.broadcast %79 : vector<1x128xf32> to vector<64x128xf32>
    %81 = arith.mulf %78, %80 : vector<64x128xf32>
    %c14 = arith.constant 14 : index
    %82 = memref.load %arg4[%c14] : memref<25xf32, #tpu.memory_space<smem>>
    %83 = vector.broadcast %82 : f32 to vector<64x128xf32>
    %84 = arith.mulf %83, %81 : vector<64x128xf32>
    %c12 = arith.constant 12 : index
    %85 = memref.load %arg4[%c12] : memref<25xf32, #tpu.memory_space<smem>>
    %c4_i32 = arith.constant 4 : i32
    %86 = tpu.dynamic_rotate %81 by %c4_i32 dim 1 : vector<64x128xf32>, i32 -> vector<64x128xf32>
    %87 = vector.broadcast %85 : f32 to vector<64x128xf32>
    %88 = arith.mulf %87, %86 : vector<64x128xf32>
    %89 = arith.addf %84, %88 : vector<64x128xf32>
    %c13 = arith.constant 13 : index
    %90 = memref.load %arg4[%c13] : memref<25xf32, #tpu.memory_space<smem>>
    %c2_i32_20 = arith.constant 2 : i32
    %91 = tpu.dynamic_rotate %81 by %c2_i32_20 dim 1 : vector<64x128xf32>, i32 -> vector<64x128xf32>
    %92 = vector.broadcast %90 : f32 to vector<64x128xf32>
    %93 = arith.mulf %92, %91 : vector<64x128xf32>
    %94 = arith.addf %89, %93 : vector<64x128xf32>
    %c4_21 = arith.constant 4 : index
    %c0_22 = arith.constant 0 : index
    %95 = vector.load %arg2[%c4_21, %c0_22] : memref<9x128xf32, #tpu.memory_space<vmem>>, vector<1x128xf32>
    %96 = vector.broadcast %95 : vector<1x128xf32> to vector<64x128xf32>
    %97 = arith.addf %94, %96 : vector<64x128xf32>
    %cst_23 = arith.constant 0.000000e+00 : f32
    %98 = vector.broadcast %cst_23 : f32 to vector<64x128xf32>
    %99 = arith.maximumf %97, %98 : vector<64x128xf32>
    %c17 = arith.constant 17 : index
    %100 = memref.load %arg4[%c17] : memref<25xf32, #tpu.memory_space<smem>>
    %101 = vector.broadcast %100 : f32 to vector<64x128xf32>
    %102 = arith.mulf %101, %99 : vector<64x128xf32>
    %c15 = arith.constant 15 : index
    %103 = memref.load %arg4[%c15] : memref<25xf32, #tpu.memory_space<smem>>
    %c4_i32_24 = arith.constant 4 : i32
    %104 = tpu.dynamic_rotate %99 by %c4_i32_24 dim 1 : vector<64x128xf32>, i32 -> vector<64x128xf32>
    %105 = vector.broadcast %103 : f32 to vector<64x128xf32>
    %106 = arith.mulf %105, %104 : vector<64x128xf32>
    %107 = arith.addf %102, %106 : vector<64x128xf32>
    %c16 = arith.constant 16 : index
    %108 = memref.load %arg4[%c16] : memref<25xf32, #tpu.memory_space<smem>>
    %c2_i32_25 = arith.constant 2 : i32
    %109 = tpu.dynamic_rotate %99 by %c2_i32_25 dim 1 : vector<64x128xf32>, i32 -> vector<64x128xf32>
    %110 = vector.broadcast %108 : f32 to vector<64x128xf32>
    %111 = arith.mulf %110, %109 : vector<64x128xf32>
    %112 = arith.addf %107, %111 : vector<64x128xf32>
    %c5_26 = arith.constant 5 : index
    %c0_27 = arith.constant 0 : index
    %113 = vector.load %arg2[%c5_26, %c0_27] : memref<9x128xf32, #tpu.memory_space<vmem>>, vector<1x128xf32>
    %114 = vector.broadcast %113 : vector<1x128xf32> to vector<64x128xf32>
    %115 = arith.addf %112, %114 : vector<64x128xf32>
    %cst_28 = arith.constant 0.000000e+00 : f32
    %116 = vector.broadcast %cst_28 : f32 to vector<64x128xf32>
    %117 = arith.maximumf %115, %116 : vector<64x128xf32>
    %c20 = arith.constant 20 : index
    %118 = memref.load %arg4[%c20] : memref<25xf32, #tpu.memory_space<smem>>
    %119 = vector.broadcast %118 : f32 to vector<64x128xf32>
    %120 = arith.mulf %119, %117 : vector<64x128xf32>
    %c18 = arith.constant 18 : index
    %121 = memref.load %arg4[%c18] : memref<25xf32, #tpu.memory_space<smem>>
    %c4_i32_29 = arith.constant 4 : i32
    %122 = tpu.dynamic_rotate %117 by %c4_i32_29 dim 1 : vector<64x128xf32>, i32 -> vector<64x128xf32>
    %123 = vector.broadcast %121 : f32 to vector<64x128xf32>
    %124 = arith.mulf %123, %122 : vector<64x128xf32>
    %125 = arith.addf %120, %124 : vector<64x128xf32>
    %c19 = arith.constant 19 : index
    %126 = memref.load %arg4[%c19] : memref<25xf32, #tpu.memory_space<smem>>
    %c2_i32_30 = arith.constant 2 : i32
    %127 = tpu.dynamic_rotate %117 by %c2_i32_30 dim 1 : vector<64x128xf32>, i32 -> vector<64x128xf32>
    %128 = vector.broadcast %126 : f32 to vector<64x128xf32>
    %129 = arith.mulf %128, %127 : vector<64x128xf32>
    %130 = arith.addf %125, %129 : vector<64x128xf32>
    %c6_31 = arith.constant 6 : index
    %c0_32 = arith.constant 0 : index
    %131 = vector.load %arg2[%c6_31, %c0_32] : memref<9x128xf32, #tpu.memory_space<vmem>>, vector<1x128xf32>
    %132 = vector.broadcast %131 : vector<1x128xf32> to vector<64x128xf32>
    %133 = arith.addf %130, %132 : vector<64x128xf32>
    %cst_33 = arith.constant 0.000000e+00 : f32
    %134 = vector.broadcast %cst_33 : f32 to vector<64x128xf32>
    %135 = arith.maximumf %133, %134 : vector<64x128xf32>
    %c23 = arith.constant 23 : index
    %136 = memref.load %arg4[%c23] : memref<25xf32, #tpu.memory_space<smem>>
    %137 = vector.broadcast %136 : f32 to vector<64x128xf32>
    %138 = arith.mulf %137, %135 : vector<64x128xf32>
    %c21 = arith.constant 21 : index
    %139 = memref.load %arg4[%c21] : memref<25xf32, #tpu.memory_space<smem>>
    %c4_i32_34 = arith.constant 4 : i32
    %140 = tpu.dynamic_rotate %135 by %c4_i32_34 dim 1 : vector<64x128xf32>, i32 -> vector<64x128xf32>
    %141 = vector.broadcast %139 : f32 to vector<64x128xf32>
    %142 = arith.mulf %141, %140 : vector<64x128xf32>
    %143 = arith.addf %138, %142 : vector<64x128xf32>
    %c22 = arith.constant 22 : index
    %144 = memref.load %arg4[%c22] : memref<25xf32, #tpu.memory_space<smem>>
    %c2_i32_35 = arith.constant 2 : i32
    %145 = tpu.dynamic_rotate %135 by %c2_i32_35 dim 1 : vector<64x128xf32>, i32 -> vector<64x128xf32>
    %146 = vector.broadcast %144 : f32 to vector<64x128xf32>
    %147 = arith.mulf %146, %145 : vector<64x128xf32>
    %148 = arith.addf %143, %147 : vector<64x128xf32>
    %c7_36 = arith.constant 7 : index
    %c0_37 = arith.constant 0 : index
    %149 = vector.load %arg2[%c7_36, %c0_37] : memref<9x128xf32, #tpu.memory_space<vmem>>, vector<1x128xf32>
    %150 = vector.broadcast %149 : vector<1x128xf32> to vector<64x128xf32>
    %151 = arith.addf %148, %150 : vector<64x128xf32>
    %cst_38 = arith.constant 0.000000e+00 : f32
    %152 = vector.broadcast %cst_38 : f32 to vector<64x128xf32>
    %153 = arith.maximumf %151, %152 : vector<64x128xf32>
    %c126_i32 = arith.constant 126 : i32
    %154 = tpu.dynamic_rotate %153 by %c126_i32 dim 1 : vector<64x128xf32>, i32 -> vector<64x128xf32>
    %155 = arith.maximumf %153, %154 : vector<64x128xf32>
    %c0_39 = arith.constant 0 : index
    %c0_40 = arith.constant 0 : index
    %156 = vector.load %arg3[%c0_39, %c0_40] : memref<3x128xf32, #tpu.memory_space<vmem>>, vector<1x128xf32>
    %157 = vector.broadcast %156 : vector<1x128xf32> to vector<64x128xf32>
    %158 = arith.mulf %155, %157 : vector<64x128xf32>
    %cst_41 = arith.constant dense<0.000000e+00> : vector<64xf32>
    %159 = vector.multi_reduction <add>, %158, %cst_41 [1] : vector<64x128xf32> to vector<64xf32>
    %160 = vector.shape_cast %159 : vector<64xf32> to vector<64x1xf32>
    %c1_42 = arith.constant 1 : index
    %c0_43 = arith.constant 0 : index
    %161 = vector.load %arg3[%c1_42, %c0_43] : memref<3x128xf32, #tpu.memory_space<vmem>>, vector<1x128xf32>
    %162 = vector.broadcast %161 : vector<1x128xf32> to vector<64x128xf32>
    %163 = arith.mulf %155, %162 : vector<64x128xf32>
    %cst_44 = arith.constant dense<0.000000e+00> : vector<64xf32>
    %164 = vector.multi_reduction <add>, %163, %cst_44 [1] : vector<64x128xf32> to vector<64xf32>
    %165 = vector.shape_cast %164 : vector<64xf32> to vector<64x1xf32>
    %c2_45 = arith.constant 2 : index
    %c0_46 = arith.constant 0 : index
    %166 = vector.load %arg3[%c2_45, %c0_46] : memref<3x128xf32, #tpu.memory_space<vmem>>, vector<1x128xf32>
    %167 = vector.broadcast %166 : vector<1x128xf32> to vector<64x128xf32>
    %168 = arith.mulf %155, %167 : vector<64x128xf32>
    %cst_47 = arith.constant dense<0.000000e+00> : vector<64xf32>
    %169 = vector.multi_reduction <add>, %168, %cst_47 [1] : vector<64x128xf32> to vector<64xf32>
    %170 = vector.shape_cast %169 : vector<64xf32> to vector<64x1xf32>
    %171 = tpu.concatenate %160, %165, %170 in 1 : vector<64x1xf32>, vector<64x1xf32>, vector<64x1xf32> -> vector<64x3xf32>
    %172 = vector.broadcast %0 : f32 to vector<64x3xf32>
    %173 = arith.addf %171, %172 : vector<64x3xf32>
    %174 = arith.index_cast %2 : i32 to index
    %c0_48 = arith.constant 0 : index
    %175 = vector.load %arg5[%174, %c0_48] : memref<64x3xf32, #tpu.memory_space<vmem>>, vector<64x3xf32>
    tpu.vector_store %arg5[%174, %c0_48], %173 {strides = array<i32>} : memref<64x3xf32, #tpu.memory_space<vmem>>, vector<64x3xf32>,
    %c1_i32_49 = arith.constant 1 : i32
    return
  }
  func.func @transform_0(%arg0: i32) -> (i32, i32) {
    %c0_i32 = arith.constant 0 : i32
    %c0_i32_0 = arith.constant 0 : i32
    return %arg0, %c0_i32 : i32, i32
  }
  func.func @transform_1(%arg0: i32) -> (i32, i32) {
    %c0_i32 = arith.constant 0 : i32
    %c0_i32_0 = arith.constant 0 : i32
    %c0_i32_1 = arith.constant 0 : i32
    return %c0_i32, %c0_i32_0 : i32, i32
  }
  func.func @transform_2(%arg0: i32) -> (i32, i32) {
    %c0_i32 = arith.constant 0 : i32
    %c0_i32_0 = arith.constant 0 : i32
    %c0_i32_1 = arith.constant 0 : i32
    return %c0_i32, %c0_i32_0 : i32, i32
  }
  func.func @transform_3(%arg0: i32) -> i32 {
    %c0_i32 = arith.constant 0 : i32
    %c0_i32_0 = arith.constant 0 : i32
    return %c0_i32 : i32
  }
  func.func @transform_4(%arg0: i32) -> (i32, i32) {
    %c0_i32 = arith.constant 0 : i32
    %c0_i32_0 = arith.constant 0 : i32
    return %arg0, %c0_i32 : i32, i32
  }
}

</mosaic_0001>

<bundles_post_ra>
// kernel: edcnn_forward.1
= control target key start
LH: loop header
LB: loop body
LE: loop exit
PB: predicated region body
PF: predicated region fallthrough
CT: control target
= control target key end

     0   :  { %9 = vsyncpa [#allocation3], 0  ;;  %s1040_s18 = smov [#allocation2]   ;;  %s1809_s0 = inlined_call_operand.vmem [shape: f32[64,128], index: 0, kind: input, shape index: {}]   ;;  %s1810_s1 = inlined_call_operand.vmem [shape: f32[9,128], index: 1, kind: input, shape index: {}]   ;;  %s1811_s2 = inlined_call_operand.vmem [shape: f32[3,128], index: 2, kind: input, shape index: {}]   ;;  %s1812_s3 = inlined_call_operand.vmem [shape: f32[25], index: 3, kind: input, shape index: {}]   ;;  %s1813_s4 = inlined_call_operand.vmem [shape: f32[64,3], index: 4, kind: output, shape index: {}]  }
   0x1   :  { %s21_s17 = sshll.u32 %s1812_s3, 4  ;;  %s22_s17 = int_to_ptr.vmem [resolvable:$true] %s21_s17 }
   0x2   :  { %24 = dma.vmem_to_smem %s22_s17, 16, %s1040_s18, [#allocation3]  }
   0x3   :  { %1038 = dma.done.wait [#allocation3], 16  }
   0x4   :  { %1039 = vsyncadd [#allocation3], 4294967280 }
   0x5   :  { %29 = sfence }
   0x6   :  { %v1077_v0 = vld [vmem:[%s1809_s0 + $0x10] sm:$0xff]  ;;  %v31_v1 = vld [vmem:[%s1809_s0] sm:$0xff]  ;;  %s1041_s23 = smov 2   ;;  %v34_v3 = vld [vmem:[%s1809_s0 + $0x18] sm:$0xff]  ;;  %s1042_s9 = smov 1   ;;  %vm952_vm0 = vcmask 15360  }
   0x7   :  { %54 = vrot.lane.b32.xlu1 %v1077_v0, %s1041_s23  ;;  %50 = vrot.lane.b32.xlu0 %v31_v1, %s1041_s23  ;;  %v1088_v2 = vld [vmem:[%s1809_s0 + $0x20] sm:$0xff]  ;;  %v32_v4 = vld [vmem:[%s1809_s0 + $0x8] sm:$0xff]  ;;  %s986_s10 = sld [smem:[#allocation2 + $0x1]]  ;;  %s1043_s29 = smov 127   ;;  %vm943_vm1 = vcmask 7168   ;;  %vm970_vm2 = vcmask 23552  }
   0x8   :  { %58 = vrot.lane.b32.xlu2 %v1088_v2, %s1041_s23  ;;  %v1101_v5 = vld [vmem:[%s1809_s0 + $0x28] sm:$0xff]  ;;  %v1110_v6 = vld [vmem:[%s1809_s0 + $0x38] sm:$0xff]  ;;  %v37_v7 = vld [vmem:[%s1809_s0 + $0x30] sm:$0xff]  ;;  %s985_s0 = sld [smem:[#allocation2 + $0x2]]  ;;  %s1044_s6 = smov 4  }
   0x9   :  { %s49_s11 = sld [smem:[#allocation2]]  ;;  %v1142_v20 = vld [vmem:[%s1810_s1] ss:$0 sm:$0xff] }
   0xa   :  { %s988_s14 = sld [smem:[#allocation2 + $0x3]] }
   0xb   :  { %s987_s15 = sld [smem:[#allocation2 + $0x5]] }
   0xc   :  { %s989_s16 = sld [smem:[#allocation2 + $0x4]] }
   0xd   :  { %v1132_v12 = vstv %s986_s10  ;;  %s990_s19 = sld [smem:[#allocation2 + $0x8]] }
   0xe   :  { %v1130_v11 = vstv %s985_s0  ;;  %s991_s20 = sld [smem:[#allocation2 + $0x6]] }
   0xf   :  { %56 = vrot.lane.b32.xlu1 %v34_v3, %s1041_s23  ;;  %52 = vrot.lane.b32.xlu0 %v32_v4, %s1041_s23  ;;  %v41_v13 = vmul.f32 %v1130_v11, %v31_v1  ;;  %v1135_v14 = vstv %s49_s11  ;;  %v44_v23 = vmul.f32 %v1130_v11, %v34_v3  ;;  %v47_v33 = vmul.f32 %v1130_v11, %v37_v7  ;;  %s992_s21 = sld [smem:[#allocation2 + $0x7]] }
  0x10   :  { %60 = vrot.lane.b32.xlu2 %v1101_v5, %s1041_s23  ;;  %v43_v41 = vmul.f32 %v1130_v11, %v1077_v0  ;;  %v42_v43 = vmul.f32 %v1130_v11, %v32_v4  ;;  %v45_v56 = vmul.f32 %v1130_v11, %v1088_v2  ;;  %v46_v58 = vmul.f32 %v1130_v11, %v1101_v5  ;;  %s993_s24 = sld [smem:[#allocation2 + $0xb]] }
  0x11   :  { %s994_s25 = sld [smem:[#allocation2 + $0x9]] }
  0x12   :  { %s995_s26 = sld [smem:[#allocation2 + $0xa]] }
  0x13   :  { %s997_s7 = sld [smem:[#allocation2 + $0xc]] }
  0x14   :  { %s996_s8 = sld [smem:[#allocation2 + $0xe]] }
  0x15   :  { %s999_s11 = sld [smem:[#allocation2 + $0x11]] }
  0x16   :  { %s1000_s12 = sld [smem:[#allocation2 + $0xf]] }
  0x17   :  { %64 = vrot.lane.b32.xlu1 %v1110_v6, %s1041_s23  ;;  %62 = vrot.lane.b32.xlu0 %v37_v7, %s1041_s23  ;;  %s1001_s13 = sld [smem:[#allocation2 + $0x10]] }
  0x18   :  { %84 = vrot.lane.b32.xlu2 %v31_v1, %s1042_s9  ;;  %s1002_s17 = sld [smem:[#allocation2 + $0x14]] }
  0x19   :  { %s1004_s18 = sld [smem:[#allocation2 + $0x13]] }
  0x1a   :  { %s1005_s22 = sld [smem:[#allocation2 + $0x17]] }
  0x1b   :  { %s1007_s3 = sld [smem:[#allocation2 + $0x16]] }
  0x1f   :  { %88 = vrot.lane.b32.xlu1 %v1077_v0, %s1042_s9  ;;  %86 = vrot.lane.b32.xlu0 %v32_v4, %s1042_s9 }
  0x20   :  { %90 = vrot.lane.b32.xlu2 %v34_v3, %s1042_s9 }
  0x27   :  { %94 = vrot.lane.b32.xlu1 %v1101_v5, %s1042_s9  ;;  %92 = vrot.lane.b32.xlu0 %v1088_v2, %s1042_s9 }
  0x28   :  { %96 = vrot.lane.b32.xlu2 %v37_v7, %s1042_s9 }
  0x2f   :  { %98 = vrot.lane.b32.xlu0 %v1110_v6, %s1042_s9 }
  0x62   :  { %v59_v8 = vpop.permute.xlu2 %58 }
  0x63   :  { %v71_v57 = vmul.f32 %v1135_v14, %v59_v8 }
  0x65   :  { %v79_v0 = vadd.f32 %v71_v57, %v45_v56 }
  0x6a   :  { %v61_v9 = vpop.permute.xlu2 %60 }
  0x6b   :  { %v72_v59 = vmul.f32 %v1135_v14, %v61_v9  ;;  %v48_v9 = vmul.f32 %v1130_v11, %v1110_v6 }
  0x6d   :  { %v80_v4 = vadd.f32 %v72_v59, %v46_v58 }
  0x72   :  { %v85_v10 = vpop.permute.xlu2 %84 }
  0x73   :  { %v101_v18 = vmul.f32 %v1132_v12, %v85_v10 }
  0x79   :  { %v55_v15 = vpop.permute.xlu1 %54  ;;  %v51_v16 = vpop.permute.xlu0 %50 }
  0x7a   :  { %v67_v17 = vmul.f32 %v1135_v14, %v51_v16  ;;  %v91_v21 = vpop.permute.xlu2 %90  ;;  %v69_v42 = vmul.f32 %v1135_v14, %v55_v15 }
  0x7b   :  { %v104_v28 = vmul.f32 %v1132_v12, %v91_v21 }
  0x7c   :  { %v75_v19 = vadd.f32 %v67_v17, %v41_v13  ;;  %v77_v47 = vadd.f32 %v69_v42, %v43_v41  ;;  %v1222_v42 = vld [vmem:[%s1810_s1 + $0x1] ss:$0 sm:$0xff] }
  0x7e   :  { %v109_v22 = vadd.f32 %v101_v18, %v75_v19 }
  0x80   :  { %v119_v24 = vadd.f32 %v1142_v20, %v109_v22 }
  0x81   :  { %v57_v25 = vpop.permute.xlu1 %56  ;;  %v53_v26 = vpop.permute.xlu0 %52 }
  0x82   :  { %v70_v27 = vmul.f32 %v1135_v14, %v57_v25  ;;  %v1148_v29 = vmax.f32 %v119_v24, 0.0  ;;  %v97_v32 = vpop.permute.xlu2 %96  ;;  %v68_v44 = vmul.f32 %v1135_v14, %v53_v26  ;;  %v1207_v26 = vstv %s988_s14 }
  0x83   :  { %v107_v38 = vmul.f32 %v1132_v12, %v97_v32 }
  0x84   :  { %v78_v30 = vadd.f32 %v70_v27, %v44_v23  ;;  %146 = vrot.lane.b32.xlu1 %v1148_v29, %s1041_s23  ;;  %v76_v50 = vadd.f32 %v68_v44, %v42_v43 }
  0x86   :  { %v112_v31 = vadd.f32 %v104_v28, %v78_v30  ;;  %v1210_v28 = vstv %s987_s15  ;;  %v1212_v30 = vstv %s989_s16  ;;  %s1003_s16 = sld [smem:[#allocation2 + $0x12]] }
  0x88   :  { %v122_v34 = vadd.f32 %v1142_v20, %v112_v31 }
  0x89   :  { %v65_v35 = vpop.permute.xlu1 %64  ;;  %v63_v36 = vpop.permute.xlu0 %62 }
  0x8a   :  { %v73_v37 = vmul.f32 %v1135_v14, %v63_v36  ;;  %v1156_v39 = vmax.f32 %v122_v34, 0.0  ;;  %v74_v10 = vmul.f32 %v1135_v14, %v65_v35 }
  0x8c   :  { %v81_v40 = vadd.f32 %v73_v37, %v47_v33  ;;  %152 = vrot.lane.b32.xlu1 %v1156_v39, %s1041_s23  ;;  %v82_v19 = vadd.f32 %v74_v10, %v48_v9 }
  0x8e   :  { %v115_v45 = vadd.f32 %v107_v38, %v81_v40 }
  0x90   :  { %v125_v46 = vadd.f32 %v1142_v20, %v115_v45 }
  0x91   :  { %v89_v48 = vpop.permute.xlu1 %88  ;;  %v87_v49 = vpop.permute.xlu0 %86 }
  0x92   :  { %v103_v51 = vmul.f32 %v1132_v12, %v89_v48  ;;  %v102_v52 = vmul.f32 %v1132_v12, %v87_v49  ;;  %v1168_v53 = vmax.f32 %v125_v46, 0.0 }
  0x94   :  { %v111_v54 = vadd.f32 %v103_v51, %v77_v47  ;;  %v110_v55 = vadd.f32 %v102_v52, %v76_v50  ;;  %158 = vrot.lane.b32.xlu1 %v1168_v53, %s1041_s23 }
  0x96   :  { %v121_v60 = vadd.f32 %v1142_v20, %v111_v54  ;;  %v120_v61 = vadd.f32 %v1142_v20, %v110_v55 }
  0x98   :  { %v129_v62 = vmax.f32 %v121_v60, 0.0  ;;  %v128_v63 = vmax.f32 %v120_v61, 0.0 }
  0x99   :  { %v95_v1 = vpop.permute.xlu1 %94  ;;  %v93_v3 = vpop.permute.xlu0 %92 }
  0x9a   :  { %v106_v7 = vmul.f32 %v1132_v12, %v95_v1  ;;  %v105_v2 = vmul.f32 %v1132_v12, %v93_v3  ;;  %150 = vrot.lane.b32.xlu0 %v129_v62, %s1041_s23  ;;  %148 = vrot.lane.b32.xlu2 %v128_v63, %s1041_s23  ;;  %v138_v33 = vmul.f32 %v1210_v28, %v128_v63 }
  0x9b   :  { %v139_v34 = vmul.f32 %v1210_v28, %v129_v62 }
  0x9c   :  { %v114_v5 = vadd.f32 %v106_v7, %v80_v4  ;;  %v113_v8 = vadd.f32 %v105_v2, %v79_v0  ;;  %182 = vrot.lane.b32.xlu1 %v128_v63, %s1042_s9  ;;  %v137_v0 = vmul.f32 %v1210_v28, %v1148_v29 }
  0x9e   :  { %v124_v13 = vadd.f32 %v1142_v20, %v114_v5  ;;  %v123_v15 = vadd.f32 %v1142_v20, %v113_v8 }
  0xa0   :  { %v132_v16 = vmax.f32 %v124_v13, 0.0  ;;  %v131_v17 = vmax.f32 %v123_v15, 0.0 }
  0xa1   :  { %v99_v18 = vpop.permute.xlu0 %98 }
  0xa2   :  { %v108_v21 = vmul.f32 %v1132_v12, %v99_v18  ;;  %156 = vrot.lane.b32.xlu0 %v132_v16, %s1041_s23  ;;  %154 = vrot.lane.b32.xlu2 %v131_v17, %s1041_s23  ;;  %v141_v48 = vmul.f32 %v1210_v28, %v131_v17  ;;  %v142_v51 = vmul.f32 %v1210_v28, %v132_v16 }
  0xa4   :  { %v116_v22 = vadd.f32 %v108_v21, %v82_v19  ;;  %188 = vrot.lane.b32.xlu1 %v131_v17, %s1042_s9  ;;  %v140_v21 = vmul.f32 %v1210_v28, %v1156_v39 }
  0xa6   :  { %v126_v6 = vadd.f32 %v1142_v20, %v116_v22 }
  0xa8   :  { %v134_v11 = vmax.f32 %v126_v6, 0.0 }
  0xaa   :  { %160 = vrot.lane.b32.xlu2 %v134_v11, %s1041_s23  ;;  %180 = vrot.lane.b32.xlu0 %v1148_v29, %s1042_s9  ;;  %v144_v7 = vmul.f32 %v1210_v28, %v134_v11 }
  0xac   :  { %194 = vrot.lane.b32.xlu1 %v134_v11, %s1042_s9 }
  0xb2   :  { %184 = vrot.lane.b32.xlu2 %v129_v62, %s1042_s9  ;;  %186 = vrot.lane.b32.xlu0 %v1156_v39, %s1042_s9 }
  0xba   :  { %190 = vrot.lane.b32.xlu2 %v132_v16, %s1042_s9  ;;  %192 = vrot.lane.b32.xlu0 %v1168_v53, %s1042_s9 }
  0xf4   :  { %v149_v12 = vpop.permute.xlu2 %148 }
  0xf5   :  { %v164_v27 = vmul.f32 %v1207_v26, %v149_v12 }
  0xf6   :  { %v147_v14 = vpop.permute.xlu1 %146 }
  0xf7   :  { %v172_v37 = vadd.f32 %v164_v27, %v138_v33  ;;  %v163_v61 = vmul.f32 %v1207_v26, %v147_v14  ;;  %v143_v27 = vmul.f32 %v1210_v28, %v1168_v53 }
  0xf9   :  { %v171_v5 = vadd.f32 %v163_v61, %v137_v0 }
  0xfc   :  { %v155_v20 = vpop.permute.xlu2 %154 }
  0xfd   :  { %v167_v45 = vmul.f32 %v1207_v26, %v155_v20 }
  0xfe   :  { %v153_v23 = vpop.permute.xlu1 %152 }
  0xff   :  { %v175_v56 = vadd.f32 %v167_v45, %v141_v48  ;;  %v166_v17 = vmul.f32 %v1207_v26, %v153_v23 }
 0x101   :  { %v174_v12 = vadd.f32 %v166_v17, %v140_v21 }
 0x104   :  { %v161_v24 = vpop.permute.xlu2 %160 }
 0x105   :  { %v170_v1 = vmul.f32 %v1207_v26, %v161_v24 }
 0x106   :  { %v1205_v25 = vpop.permute.xlu1 %158 }
 0x107   :  { %v178_v15 = vadd.f32 %v170_v1, %v144_v7  ;;  %v169_v39 = vmul.f32 %v1207_v26, %v1205_v25 }
 0x109   :  { %v177_v33 = vadd.f32 %v169_v39, %v143_v27 }
 0x10c   :  { %v185_v31 = vpop.permute.xlu2 %184  ;;  %v151_v32 = vpop.permute.xlu0 %150 }
 0x10d   :  { %v165_v35 = vmul.f32 %v1207_v26, %v151_v32  ;;  %v199_v38 = vmul.f32 %v1212_v30, %v185_v31 }
 0x10e   :  { %v183_v36 = vpop.permute.xlu1 %182 }
 0x10f   :  { %v173_v40 = vadd.f32 %v165_v35, %v139_v34  ;;  %v198_v41 = vmul.f32 %v1212_v30, %v183_v36 }
 0x111   :  { %v207_v43 = vadd.f32 %v199_v38, %v173_v40  ;;  %v206_v44 = vadd.f32 %v198_v41, %v172_v37  ;;  %v232_v41 = vstv %s990_s19 }
 0x113   :  { %v217_v46 = vadd.f32 %v1222_v42, %v207_v43  ;;  %v216_v47 = vadd.f32 %v1222_v42, %v206_v44  ;;  %v292_v44 = vstv %s992_s21  ;;  %s1006_s21 = sld [smem:[#allocation2 + $0x15]] }
 0x114   :  { %v191_v49 = vpop.permute.xlu2 %190  ;;  %v157_v50 = vpop.permute.xlu0 %156 }
 0x115   :  { %v168_v52 = vmul.f32 %v1207_v26, %v157_v50  ;;  %v1230_v54 = vmax.f32 %v217_v46, 0.0  ;;  %v1232_v55 = vmax.f32 %v216_v47, 0.0  ;;  %v202_v58 = vmul.f32 %v1212_v30, %v191_v49 }
 0x116   :  { %v189_v57 = vpop.permute.xlu1 %188 }
 0x117   :  { %v176_v59 = vadd.f32 %v168_v52, %v142_v51  ;;  %v201_v60 = vmul.f32 %v1212_v30, %v189_v57  ;;  %246 = vrot.lane.b32.xlu1 %v1230_v54, %s1041_s23  ;;  %244 = vrot.lane.b32.xlu0 %v1232_v55, %s1041_s23  ;;  %v234_v46 = vmul.f32 %v232_v41, %v1232_v55  ;;  %v1016_v51 = vld [vmem:[%s1810_s1 + $0x2] ss:$0 sm:$0xff] }
 0x119   :  { %v210_v62 = vadd.f32 %v202_v58, %v176_v59  ;;  %v209_v63 = vadd.f32 %v201_v60, %v175_v56 }
 0x11b   :  { %v220_v3 = vadd.f32 %v1222_v42, %v210_v62  ;;  %v219_v4 = vadd.f32 %v1222_v42, %v209_v63 }
 0x11c   :  { %v181_v2 = vpop.permute.xlu0 %180 }
 0x11d   :  { %v197_v8 = vmul.f32 %v1212_v30, %v181_v2  ;;  %v1248_v9 = vmax.f32 %v220_v3, 0.0  ;;  %v1250_v10 = vmax.f32 %v219_v4, 0.0  ;;  %v235_v2 = vmul.f32 %v232_v41, %v1230_v54 }
 0x11e   :  { %v195_v13 = vpop.permute.xlu1 %194 }
 0x11f   :  { %v205_v16 = vadd.f32 %v197_v8, %v171_v5  ;;  %v204_v29 = vmul.f32 %v1212_v30, %v195_v13  ;;  %252 = vrot.lane.b32.xlu1 %v1248_v9, %s1041_s23  ;;  %250 = vrot.lane.b32.xlu0 %v1250_v10, %s1041_s23 }
 0x121   :  { %v212_v18 = vadd.f32 %v204_v29, %v178_v15  ;;  %v215_v19 = vadd.f32 %v1222_v42, %v205_v16 }
 0x123   :  { %v223_v22 = vmax.f32 %v215_v19, 0.0  ;;  %v222_v6 = vadd.f32 %v1222_v42, %v212_v18 }
 0x124   :  { %v187_v11 = vpop.permute.xlu0 %186 }
 0x125   :  { %v200_v14 = vmul.f32 %v1212_v30, %v187_v11  ;;  %242 = vrot.lane.b32.xlu2 %v223_v22, %s1041_s23  ;;  %v1264_v20 = vmax.f32 %v222_v6, 0.0  ;;  %v233_v48 = vmul.f32 %v232_v41, %v223_v22 }
 0x127   :  { %v208_v24 = vadd.f32 %v200_v14, %v174_v12  ;;  %256 = vrot.lane.b32.xlu0 %v1264_v20, %s1041_s23  ;;  %276 = vrot.lane.b32.xlu1 %v223_v22, %s1042_s9  ;;  %v240_v14 = vmul.f32 %v232_v41, %v1264_v20 }
 0x129   :  { %v218_v23 = vadd.f32 %v1222_v42, %v208_v24 }
 0x12b   :  { %v226_v31 = vmax.f32 %v218_v23, 0.0 }
 0x12c   :  { %v193_v32 = vpop.permute.xlu0 %192 }
 0x12d   :  { %v203_v34 = vmul.f32 %v1212_v30, %v193_v32  ;;  %248 = vrot.lane.b32.xlu2 %v226_v31, %s1041_s23  ;;  %v236_v4 = vmul.f32 %v232_v41, %v226_v31 }
 0x12f   :  { %v211_v35 = vadd.f32 %v203_v34, %v177_v33  ;;  %280 = vrot.lane.b32.xlu0 %v1230_v54, %s1042_s9  ;;  %282 = vrot.lane.b32.xlu1 %v226_v31, %s1042_s9  ;;  %v238_v31 = vmul.f32 %v232_v41, %v1248_v9 }
 0x131   :  { %v221_v25 = vadd.f32 %v1222_v42, %v211_v35  ;;  %v258_v42 = vstv %s991_s20 }
 0x133   :  { %v1280_v26 = vmax.f32 %v221_v25, 0.0 }
 0x135   :  { %254 = vrot.lane.b32.xlu2 %v1280_v26, %s1041_s23  ;;  %v239_v27 = vmul.f32 %v232_v41, %v1280_v26 }
 0x137   :  { %286 = vrot.lane.b32.xlu0 %v1248_v9, %s1042_s9  ;;  %288 = vrot.lane.b32.xlu1 %v1280_v26, %s1042_s9 }
 0x13d   :  { %278 = vrot.lane.b32.xlu2 %v1232_v55, %s1042_s9  ;;  %v237_v55 = vmul.f32 %v232_v41, %v1250_v10 }
 0x145   :  { %284 = vrot.lane.b32.xlu2 %v1250_v10, %s1042_s9 }
 0x14d   :  { %290 = vrot.lane.b32.xlu2 %v1264_v20, %s1042_s9 }
 0x17f   :  { %v243_v53 = vpop.permute.xlu2 %242 }
 0x180   :  { %v259_v45 = vmul.f32 %v258_v42, %v243_v53 }
 0x182   :  { %v267_v57 = vadd.f32 %v259_v45, %v233_v48 }
 0x187   :  { %v249_v28 = vpop.permute.xlu2 %248 }
 0x188   :  { %v262_v63 = vmul.f32 %v258_v42, %v249_v28 }
 0x189   :  { %v245_v30 = vpop.permute.xlu0 %244  ;;  %v247_v36 = vpop.permute.xlu1 %246 }
 0x18a   :  { %v260_v43 = vmul.f32 %v258_v42, %v245_v30  ;;  %v261_v0 = vmul.f32 %v258_v42, %v247_v36  ;;  %v270_v15 = vadd.f32 %v262_v63, %v236_v4 }
 0x18c   :  { %v268_v49 = vadd.f32 %v260_v43, %v234_v46  ;;  %v269_v17 = vadd.f32 %v261_v0, %v235_v2 }
 0x18f   :  { %v255_v37 = vpop.permute.xlu2 %254 }
 0x190   :  { %v265_v11 = vmul.f32 %v258_v42, %v255_v37 }
 0x191   :  { %v251_v38 = vpop.permute.xlu0 %250  ;;  %v253_v40 = vpop.permute.xlu1 %252 }
 0x192   :  { %v263_v60 = vmul.f32 %v258_v42, %v251_v38  ;;  %v264_v12 = vmul.f32 %v258_v42, %v253_v40  ;;  %v273_v53 = vadd.f32 %v265_v11, %v239_v27 }
 0x194   :  { %v271_v5 = vadd.f32 %v263_v60, %v237_v55  ;;  %v272_v28 = vadd.f32 %v264_v12, %v238_v31 }
 0x197   :  { %v279_v47 = vpop.permute.xlu2 %278 }
 0x198   :  { %v294_v50 = vmul.f32 %v292_v44, %v279_v47 }
 0x199   :  { %v257_v52 = vpop.permute.xlu0 %256  ;;  %v277_v56 = vpop.permute.xlu1 %276 }
 0x19a   :  { %v302_v58 = vadd.f32 %v294_v50, %v268_v49  ;;  %v293_v59 = vmul.f32 %v292_v44, %v277_v56  ;;  %v266_v21 = vmul.f32 %v258_v42, %v257_v52  ;;  %v1343_v49 = vstv %s993_s24 }
 0x19b   :  { %v1345_v50 = vstv %s994_s25 }
 0x19c   :  { %v301_v61 = vadd.f32 %v293_v59, %v267_v57  ;;  %v312_v62 = vadd.f32 %v1016_v51, %v302_v58  ;;  %v274_v33 = vadd.f32 %v266_v21, %v240_v14 }
 0x19e   :  { %v1299_v1 = vmax.f32 %v312_v62, 0.0  ;;  %v311_v3 = vadd.f32 %v1016_v51, %v301_v61  ;;  %v1356_v61 = vld [vmem:[%s1810_s1 + $0x3] ss:$0 sm:$0xff] }
 0x19f   :  { %v285_v7 = vpop.permute.xlu2 %284 }
 0x1a0   :  { %v297_v8 = vmul.f32 %v292_v44, %v285_v7  ;;  %340 = vrot.lane.b32.xlu1 %v1299_v1, %s1041_s23  ;;  %v1304_v13 = vmax.f32 %v311_v3, 0.0 }
 0x1a1   :  { %v281_v16 = vpop.permute.xlu0 %280  ;;  %v283_v29 = vpop.permute.xlu1 %282 }
 0x1a2   :  { %v305_v18 = vadd.f32 %v297_v8, %v271_v5  ;;  %v295_v10 = vmul.f32 %v292_v44, %v281_v16  ;;  %v296_v19 = vmul.f32 %v292_v44, %v283_v29  ;;  %338 = vrot.lane.b32.xlu0 %v1304_v13, %s1041_s23  ;;  %v329_v57 = vmul.f32 %v1343_v49, %v1304_v13 }
 0x1a4   :  { %v303_v22 = vadd.f32 %v295_v10, %v269_v17  ;;  %v304_v54 = vadd.f32 %v296_v19, %v270_v15  ;;  %v315_v6 = vadd.f32 %v1016_v51, %v305_v18 }
 0x1a6   :  { %v1309_v24 = vmax.f32 %v315_v6, 0.0  ;;  %v313_v39 = vadd.f32 %v1016_v51, %v303_v22  ;;  %v314_v23 = vadd.f32 %v1016_v51, %v304_v54 }
 0x1a7   :  { %v291_v32 = vpop.permute.xlu2 %290 }
 0x1a8   :  { %v300_v34 = vmul.f32 %v292_v44, %v291_v32  ;;  %346 = vrot.lane.b32.xlu1 %v1309_v24, %s1041_s23  ;;  %v1315_v35 = vmax.f32 %v313_v39, 0.0  ;;  %v322_v25 = vmax.f32 %v314_v23, 0.0  ;;  %v330_v23 = vmul.f32 %v1343_v49, %v1299_v1 }
 0x1a9   :  { %v287_v20 = vpop.permute.xlu0 %286  ;;  %v289_v30 = vpop.permute.xlu1 %288 }
 0x1aa   :  { %v308_v36 = vadd.f32 %v300_v34, %v274_v33  ;;  %v298_v37 = vmul.f32 %v292_v44, %v287_v20  ;;  %v299_v38 = vmul.f32 %v292_v44, %v289_v30  ;;  %342 = vrot.lane.b32.xlu2 %v1315_v35, %s1041_s23  ;;  %344 = vrot.lane.b32.xlu0 %v322_v25, %s1041_s23 }
 0x1ab   :  { %v332_v4 = vmul.f32 %v1343_v49, %v322_v25  ;;  %v331_v6 = vmul.f32 %v1343_v49, %v1315_v35 }
 0x1ac   :  { %v306_v9 = vadd.f32 %v298_v37, %v272_v28  ;;  %v307_v26 = vadd.f32 %v299_v38, %v273_v53  ;;  %v318_v40 = vadd.f32 %v1016_v51, %v308_v36 }
 0x1ae   :  { %v1320_v41 = vmax.f32 %v318_v40, 0.0  ;;  %v316_v42 = vadd.f32 %v1016_v51, %v306_v9  ;;  %v317_v43 = vadd.f32 %v1016_v51, %v307_v26  ;;  %v1347_v51 = vstv %s995_s26 }
 0x1af   :  { %v333_v26 = vmul.f32 %v1343_v49, %v1309_v24 }
 0x1b0   :  { %352 = vrot.lane.b32.xlu1 %v1320_v41, %s1041_s23  ;;  %v1324_v45 = vmax.f32 %v316_v42, 0.0  ;;  %v325_v46 = vmax.f32 %v317_v43, 0.0 }
 0x1b2   :  { %348 = vrot.lane.b32.xlu2 %v1324_v45, %s1041_s23  ;;  %350 = vrot.lane.b32.xlu0 %v325_v46, %s1041_s23  ;;  %v335_v18 = vmul.f32 %v1343_v49, %v325_v46 }
 0x1b8   :  { %376 = vrot.lane.b32.xlu1 %v1315_v35, %s1042_s9 }
 0x1ba   :  { %372 = vrot.lane.b32.xlu2 %v1304_v13, %s1042_s9  ;;  %374 = vrot.lane.b32.xlu0 %v1299_v1, %s1042_s9  ;;  %v334_v1 = vmul.f32 %v1343_v49, %v1324_v45 }
 0x1c0   :  { %382 = vrot.lane.b32.xlu1 %v1324_v45, %s1042_s9 }
 0x1c2   :  { %378 = vrot.lane.b32.xlu2 %v322_v25, %s1042_s9  ;;  %380 = vrot.lane.b32.xlu0 %v1309_v24, %s1042_s9 }
 0x1ca   :  { %384 = vrot.lane.b32.xlu2 %v325_v46, %s1042_s9  ;;  %386 = vrot.lane.b32.xlu0 %v1320_v41, %s1042_s9  ;;  %s998_s9 = sld [smem:[#allocation2 + $0xd]] }
 0x204   :  { %v343_v44 = vpop.permute.xlu2 %342 }
 0x205   :  { %v357_v21 = vmul.f32 %v1345_v50, %v343_v44 }
 0x207   :  { %v365_v39 = vadd.f32 %v357_v21, %v331_v6 }
 0x20c   :  { %v349_v47 = vpop.permute.xlu2 %348 }
 0x20d   :  { %v360_v53 = vmul.f32 %v1345_v50, %v349_v47 }
 0x20f   :  { %v368_v9 = vadd.f32 %v360_v53, %v334_v1 }
 0x212   :  { %v341_v48 = vpop.permute.xlu1 %340 }
 0x213   :  { %v356_v11 = vmul.f32 %v1345_v50, %v341_v48 }
 0x214   :  { %v373_v52 = vpop.permute.xlu2 %372  ;;  %v339_v56 = vpop.permute.xlu0 %338 }
 0x215   :  { %v355_v58 = vmul.f32 %v1345_v50, %v339_v56  ;;  %v389_v59 = vmul.f32 %v1347_v51, %v373_v52  ;;  %v364_v33 = vadd.f32 %v356_v11, %v330_v23 }
 0x217   :  { %v363_v60 = vadd.f32 %v355_v58, %v329_v57  ;;  %v336_v57 = vmul.f32 %v1343_v49, %v1320_v41 }
 0x219   :  { %v397_v62 = vadd.f32 %v389_v59, %v363_v60 }
 0x21a   :  { %v347_v63 = vpop.permute.xlu1 %346 }
 0x21b   :  { %v1359_v0 = vadd.f32 %v1356_v61, %v397_v62  ;;  %v359_v30 = vmul.f32 %v1345_v50, %v347_v63 }
 0x21c   :  { %v379_v55 = vpop.permute.xlu2 %378  ;;  %v345_v3 = vpop.permute.xlu0 %344 }
 0x21d   :  { %v358_v7 = vmul.f32 %v1345_v50, %v345_v3  ;;  %v415_v2 = vmax.f32 %v1359_v0, 0.0  ;;  %v392_v5 = vmul.f32 %v1347_v51, %v379_v55  ;;  %v367_v46 = vadd.f32 %v359_v30, %v333_v26  ;;  %v1460_v30 = vld [vmem:[%s1810_s1 + $0x4] ss:$0 sm:$0xff] }
 0x21f   :  { %v366_v8 = vadd.f32 %v358_v7, %v332_v4  ;;  %423 = vrot.lane.b32.xlu1 %v415_v2, %s1043_s29 }
 0x221   :  { %v400_v13 = vadd.f32 %v392_v5, %v366_v8 }
 0x222   :  { %v353_v15 = vpop.permute.xlu1 %352 }
 0x223   :  { %v1369_v16 = vadd.f32 %v1356_v61, %v400_v13  ;;  %v362_v52 = vmul.f32 %v1345_v50, %v353_v15 }
 0x224   :  { %v385_v29 = vpop.permute.xlu2 %384  ;;  %v351_v17 = vpop.permute.xlu0 %350 }
 0x225   :  { %v361_v10 = vmul.f32 %v1345_v50, %v351_v17  ;;  %v418_v19 = vmax.f32 %v1369_v16, 0.0  ;;  %v395_v22 = vmul.f32 %v1347_v51, %v385_v29  ;;  %v370_v60 = vadd.f32 %v362_v52, %v336_v57  ;;  %v1018_v50 = vld [vmem:[%s1810_s1 + $0x8] ss:$0 sm:$0xff] }
 0x227   :  { %v369_v54 = vadd.f32 %v361_v10, %v335_v18  ;;  %429 = vrot.lane.b32.xlu1 %v418_v19, %s1043_s29 }
 0x229   :  { %v403_v12 = vadd.f32 %v395_v22, %v369_v54 }
 0x22a   :  { %v377_v14 = vpop.permute.xlu1 %376 }
 0x22b   :  { %v391_v27 = vmul.f32 %v1347_v51, %v377_v14  ;;  %v1386_v31 = vadd.f32 %v1356_v61, %v403_v12 }
 0x22c   :  { %v375_v32 = vpop.permute.xlu0 %374 }
 0x22d   :  { %v399_v34 = vadd.f32 %v391_v27, %v365_v39  ;;  %v390_v25 = vmul.f32 %v1347_v51, %v375_v32  ;;  %v421_v35 = vmax.f32 %v1386_v31, 0.0  ;;  %v1448_v32 = vstv %s997_s7 }
 0x22f   :  { %v398_v28 = vadd.f32 %v390_v25, %v364_v33  ;;  %435 = vrot.lane.b32.xlu1 %v421_v35, %s1043_s29  ;;  %v409_v20 = vadd.f32 %v1356_v61, %v399_v34  ;;  %v1451_v25 = vstv %s996_s8 }
 0x231   :  { %v417_v36 = vmax.f32 %v409_v20, 0.0  ;;  %v408_v37 = vadd.f32 %v1356_v61, %v398_v28 }
 0x232   :  { %v383_v38 = vpop.permute.xlu1 %382 }
 0x233   :  { %v394_v40 = vmul.f32 %v1347_v51, %v383_v38  ;;  %427 = vrot.lane.b32.xlu0 %v417_v36, %s1043_s29  ;;  %v416_v42 = vmax.f32 %v408_v37, 0.0 }
 0x234   :  { %v381_v43 = vpop.permute.xlu0 %380 }
 0x235   :  { %v402_v44 = vadd.f32 %v394_v40, %v368_v9  ;;  %v393_v45 = vmul.f32 %v1347_v51, %v381_v43  ;;  %425 = vrot.lane.b32.xlu2 %v416_v42, %s1043_s29 }
 0x237   :  { %v401_v47 = vadd.f32 %v393_v45, %v367_v46  ;;  %v412_v48 = vadd.f32 %v1356_v61, %v402_v44 }
 0x239   :  { %v420_v56 = vmax.f32 %v412_v48, 0.0  ;;  %v411_v24 = vadd.f32 %v1356_v61, %v401_v47 }
 0x23b   :  { %433 = vrot.lane.b32.xlu0 %v420_v56, %s1043_s29  ;;  %v419_v58 = vmax.f32 %v411_v24, 0.0 }
 0x23c   :  { %v387_v59 = vpop.permute.xlu0 %386 }
 0x23d   :  { %v396_v62 = vmul.f32 %v1347_v51, %v387_v59  ;;  %431 = vrot.lane.b32.xlu2 %v419_v58, %s1043_s29 }
 0x23f   :  { %v404_v63 = vadd.f32 %v396_v62, %v370_v60 }
 0x241   :  { %v414_v55 = vadd.f32 %v1356_v61, %v404_v63 }
 0x243   :  { %v422_v3 = vmax.f32 %v414_v55, 0.0 }
 0x245   :  { %437 = vrot.lane.b32.xlu2 %v422_v3, %s1043_s29 }
 0x28f   :  { %v426_v41 = vpop.permute.xlu2 %425 }
 0x290   :  { %v440_v49 = vmax.f32 %v416_v42, %v426_v41 }
 0x291   :  { %v424_v4 = vpop.permute.xlu1 %423 }
 0x292   :  { %v1416_v7 = vmul.f32 %v1018_v50, %v440_v49  ;;  %v439_v51 = vmax.f32 %v415_v2, %v424_v4 }
 0x294   :  { %v449_v5 = vmul.f32 %v1018_v50, %v439_v51  ;;  %470 = vrot.lane.b32.xlu1 %v1416_v7, %s1044_s6  ;;  %v460_v52 = vmul.f32 %v1451_v25, %v1416_v7 }
 0x296   :  { %468 = vrot.lane.b32.xlu0 %v449_v5, %s1044_s6  ;;  %v459_v53 = vmul.f32 %v1451_v25, %v449_v5 }
 0x297   :  { %v432_v61 = vpop.permute.xlu2 %431 }
 0x298   :  { %v443_v8 = vmax.f32 %v419_v58, %v432_v61 }
 0x299   :  { %v430_v13 = vpop.permute.xlu1 %429 }
 0x29a   :  { %v1423_v15 = vmul.f32 %v1018_v50, %v443_v8  ;;  %v442_v29 = vmax.f32 %v418_v19, %v430_v13 }
 0x29c   :  { %v452_v17 = vmul.f32 %v1018_v50, %v442_v29  ;;  %476 = vrot.lane.b32.xlu1 %v1423_v15, %s1044_s6 }
 0x29e   :  { %474 = vrot.lane.b32.xlu0 %v452_v17, %s1044_s6  ;;  %v462_v42 = vmul.f32 %v1451_v25, %v452_v17 }
 0x29f   :  { %v438_v0 = vpop.permute.xlu2 %437 }
 0x2a0   :  { %v446_v2 = vmax.f32 %v422_v3, %v438_v0  ;;  %v463_v0 = vmul.f32 %v1451_v25, %v1423_v15 }
 0x2a1   :  { %v436_v18 = vpop.permute.xlu1 %435 }
 0x2a2   :  { %v1430_v10 = vmul.f32 %v1018_v50, %v446_v2  ;;  %v445_v21 = vmax.f32 %v421_v35, %v436_v18  ;;  %v1453_v35 = vstv %s998_s9 }
 0x2a4   :  { %v455_v22 = vmul.f32 %v1018_v50, %v445_v21  ;;  %482 = vrot.lane.b32.xlu1 %v1430_v10, %s1044_s6 }
 0x2a5   :  { %v428_v54 = vpop.permute.xlu0 %427 }
 0x2a6   :  { %v441_v6 = vmax.f32 %v417_v36, %v428_v54  ;;  %480 = vrot.lane.b32.xlu0 %v455_v22, %s1044_s6 }
 0x2a8   :  { %v451_v16 = vmul.f32 %v1018_v50, %v441_v6 }
 0x2aa   :  { %472 = vrot.lane.b32.xlu2 %v451_v16, %s1044_s6  ;;  %v461_v45 = vmul.f32 %v1451_v25, %v451_v16 }
 0x2ac   :  { %506 = vrot.lane.b32.xlu1 %v451_v16, %s1041_s23 }
 0x2ad   :  { %v434_v19 = vpop.permute.xlu0 %433 }
 0x2ae   :  { %v444_v11 = vmax.f32 %v420_v56, %v434_v19  ;;  %504 = vrot.lane.b32.xlu0 %v1416_v7, %s1041_s23 }
 0x2b0   :  { %v454_v12 = vmul.f32 %v1018_v50, %v444_v11  ;;  %v465_v50 = vmul.f32 %v1451_v25, %v455_v22 }
 0x2b2   :  { %478 = vrot.lane.b32.xlu2 %v454_v12, %s1044_s6  ;;  %v464_v51 = vmul.f32 %v1451_v25, %v454_v12 }
 0x2b4   :  { %512 = vrot.lane.b32.xlu1 %v454_v12, %s1041_s23 }
 0x2b6   :  { %510 = vrot.lane.b32.xlu0 %v1423_v15, %s1041_s23 }
 0x2ba   :  { %502 = vrot.lane.b32.xlu2 %v449_v5, %s1041_s23 }
 0x2be   :  { %516 = vrot.lane.b32.xlu0 %v1430_v10, %s1041_s23 }
 0x2c2   :  { %508 = vrot.lane.b32.xlu2 %v452_v17, %s1041_s23 }
 0x2ca   :  { %514 = vrot.lane.b32.xlu2 %v455_v22, %s1041_s23 }
 0x304   :  { %v473_v14 = vpop.permute.xlu2 %472 }
 0x305   :  { %v487_v40 = vmul.f32 %v1448_v32, %v473_v14 }
 0x306   :  { %v471_v39 = vpop.permute.xlu1 %470 }
 0x307   :  { %v486_v46 = vmul.f32 %v1448_v32, %v471_v39  ;;  %v495_v24 = vadd.f32 %v487_v40, %v461_v45  ;;  %v1536_v40 = vstv %s1001_s13 }
 0x308   :  { %v469_v23 = vpop.permute.xlu0 %468 }
 0x309   :  { %v485_v34 = vmul.f32 %v1448_v32, %v469_v23  ;;  %v494_v59 = vadd.f32 %v486_v46, %v460_v52 }
 0x30b   :  { %v493_v20 = vadd.f32 %v485_v34, %v459_v53 }
 0x30c   :  { %v479_v27 = vpop.permute.xlu2 %478 }
 0x30d   :  { %v490_v41 = vmul.f32 %v1448_v32, %v479_v27 }
 0x30e   :  { %v477_v31 = vpop.permute.xlu1 %476 }
 0x30f   :  { %v489_v5 = vmul.f32 %v1448_v32, %v477_v31  ;;  %v498_v18 = vadd.f32 %v490_v41, %v464_v51 }
 0x310   :  { %v475_v33 = vpop.permute.xlu0 %474 }
 0x311   :  { %v488_v9 = vmul.f32 %v1448_v32, %v475_v33  ;;  %v497_v16 = vadd.f32 %v489_v5, %v463_v0  ;;  %v466_v33 = vmul.f32 %v1451_v25, %v1430_v10 }
 0x313   :  { %v496_v47 = vadd.f32 %v488_v9, %v462_v42  ;;  %v580_v9 = vstv %s1000_s12 }
 0x314   :  { %v503_v28 = vpop.permute.xlu2 %502 }
 0x315   :  { %v519_v1 = vmul.f32 %v1453_v35, %v503_v28 }
 0x316   :  { %v483_v36 = vpop.permute.xlu1 %482 }
 0x317   :  { %v527_v37 = vadd.f32 %v519_v1, %v493_v20  ;;  %v492_v23 = vmul.f32 %v1448_v32, %v483_v36 }
 0x318   :  { %v481_v38 = vpop.permute.xlu0 %480 }
 0x319   :  { %v537_v26 = vadd.f32 %v1460_v30, %v527_v37  ;;  %v491_v62 = vmul.f32 %v1448_v32, %v481_v38  ;;  %v500_v28 = vadd.f32 %v492_v23, %v466_v33  ;;  %v1534_v38 = vstv %s999_s11 }
 0x31b   :  { %v1466_v43 = vmax.f32 %v537_v26, 0.0  ;;  %v499_v8 = vadd.f32 %v491_v62, %v465_v50 }
 0x31c   :  { %v509_v44 = vpop.permute.xlu2 %508 }
 0x31d   :  { %v522_v48 = vmul.f32 %v1453_v35, %v509_v44  ;;  %564 = vrot.lane.b32.xlu1 %v1466_v43, %s1044_s6  ;;  %v555_v5 = vmul.f32 %v1534_v38, %v1466_v43 }
 0x31e   :  { %v507_v56 = vpop.permute.xlu1 %506 }
 0x31f   :  { %v530_v57 = vadd.f32 %v522_v48, %v496_v47  ;;  %v521_v58 = vmul.f32 %v1453_v35, %v507_v56  ;;  %v1543_v48 = vld [vmem:[%s1810_s1 + $0x5] ss:$0 sm:$0xff] }
 0x320   :  { %v505_v60 = vpop.permute.xlu0 %504 }
 0x321   :  { %v529_v63 = vadd.f32 %v521_v58, %v495_v24  ;;  %v520_v55 = vmul.f32 %v1453_v35, %v505_v60  ;;  %v540_v3 = vadd.f32 %v1460_v30, %v530_v57 }
 0x323   :  { %v528_v49 = vadd.f32 %v520_v55, %v494_v59  ;;  %v1481_v4 = vmax.f32 %v540_v3, 0.0  ;;  %v539_v7 = vadd.f32 %v1460_v30, %v529_v63 }
 0x324   :  { %v515_v61 = vpop.permute.xlu2 %514 }
 0x325   :  { %v525_v13 = vmul.f32 %v1453_v35, %v515_v61  ;;  %570 = vrot.lane.b32.xlu1 %v1481_v4, %s1044_s6  ;;  %v547_v29 = vmax.f32 %v539_v7, 0.0  ;;  %v538_v17 = vadd.f32 %v1460_v30, %v528_v49 }
 0x326   :  { %v513_v2 = vpop.permute.xlu1 %512 }
 0x327   :  { %v533_v21 = vadd.f32 %v525_v13, %v499_v8  ;;  %v524_v22 = vmul.f32 %v1453_v35, %v513_v2  ;;  %568 = vrot.lane.b32.xlu0 %v547_v29, %s1044_s6  ;;  %v1494_v54 = vmax.f32 %v538_v17, 0.0  ;;  %v557_v42 = vmul.f32 %v1534_v38, %v547_v29 }
 0x328   :  { %v511_v6 = vpop.permute.xlu0 %510 }
 0x329   :  { %v532_v19 = vadd.f32 %v524_v22, %v498_v18  ;;  %v523_v11 = vmul.f32 %v1453_v35, %v511_v6  ;;  %566 = vrot.lane.b32.xlu2 %v1494_v54, %s1044_s6  ;;  %v543_v12 = vadd.f32 %v1460_v30, %v533_v21  ;;  %v556_v50 = vmul.f32 %v1534_v38, %v1494_v54 }
 0x32b   :  { %v531_v15 = vadd.f32 %v523_v11, %v497_v16  ;;  %v1500_v14 = vmax.f32 %v543_v12, 0.0  ;;  %v542_v39 = vadd.f32 %v1460_v30, %v532_v19  ;;  %v558_v12 = vmul.f32 %v1534_v38, %v1481_v4 }
 0x32d   :  { %576 = vrot.lane.b32.xlu1 %v1500_v14, %s1044_s6  ;;  %v550_v27 = vmax.f32 %v542_v39, 0.0  ;;  %v541_v31 = vadd.f32 %v1460_v30, %v531_v15 }
 0x32f   :  { %574 = vrot.lane.b32.xlu0 %v550_v27, %s1044_s6  ;;  %v1510_v34 = vmax.f32 %v541_v31, 0.0  ;;  %v560_v58 = vmul.f32 %v1534_v38, %v550_v27 }
 0x330   :  { %v517_v53 = vpop.permute.xlu0 %516 }
 0x331   :  { %v526_v20 = vmul.f32 %v1453_v35, %v517_v53  ;;  %572 = vrot.lane.b32.xlu2 %v1510_v34, %s1044_s6 }
 0x333   :  { %v534_v32 = vadd.f32 %v526_v20, %v500_v28 }
 0x335   :  { %600 = vrot.lane.b32.xlu1 %v1494_v54, %s1041_s23  ;;  %v544_v1 = vadd.f32 %v1460_v30, %v534_v32 }
 0x337   :  { %598 = vrot.lane.b32.xlu0 %v1466_v43, %s1041_s23  ;;  %v1520_v10 = vmax.f32 %v544_v1, 0.0  ;;  %v559_v43 = vmul.f32 %v1534_v38, %v1510_v34 }
 0x339   :  { %578 = vrot.lane.b32.xlu2 %v1520_v10, %s1044_s6 }
 0x33d   :  { %606 = vrot.lane.b32.xlu1 %v1510_v34, %s1041_s23 }
 0x33f   :  { %604 = vrot.lane.b32.xlu0 %v1481_v4, %s1041_s23  ;;  %v562_v4 = vmul.f32 %v1534_v38, %v1520_v10 }
 0x341   :  { %602 = vrot.lane.b32.xlu2 %v547_v29, %s1041_s23 }
 0x345   :  { %612 = vrot.lane.b32.xlu1 %v1520_v10, %s1041_s23 }
 0x347   :  { %610 = vrot.lane.b32.xlu0 %v1500_v14, %s1041_s23 }
 0x349   :  { %608 = vrot.lane.b32.xlu2 %v550_v27, %s1041_s23 }
 0x383   :  { %v567_v25 = vpop.permute.xlu2 %566 }
 0x384   :  { %v582_v63 = vmul.f32 %v580_v9, %v567_v25 }
 0x386   :  { %v590_v51 = vadd.f32 %v582_v63, %v556_v50 }
 0x38b   :  { %v573_v35 = vpop.permute.xlu2 %572 }
 0x38c   :  { %v585_v18 = vmul.f32 %v580_v9, %v573_v35 }
 0x38e   :  { %v593_v11 = vadd.f32 %v585_v18, %v559_v43 }
 0x38f   :  { %v565_v30 = vpop.permute.xlu1 %564 }
 0x390   :  { %v581_v41 = vmul.f32 %v580_v9, %v565_v30  ;;  %v561_v30 = vmul.f32 %v1534_v38, %v1500_v14 }
 0x392   :  { %v589_v29 = vadd.f32 %v581_v41, %v555_v5 }
 0x393   :  { %v579_v36 = vpop.permute.xlu2 %578 }
 0x394   :  { %v588_v34 = vmul.f32 %v580_v9, %v579_v36 }
 0x396   :  { %v596_v35 = vadd.f32 %v588_v34, %v562_v4 }
 0x397   :  { %v571_v37 = vpop.permute.xlu1 %570 }
 0x398   :  { %v584_v54 = vmul.f32 %v580_v9, %v571_v37 }
 0x399   :  { %v569_v26 = vpop.permute.xlu0 %568 }
 0x39a   :  { %v583_v46 = vmul.f32 %v580_v9, %v569_v26  ;;  %v592_v27 = vadd.f32 %v584_v54, %v558_v12 }
 0x39b   :  { %v603_v44 = vpop.permute.xlu2 %602 }
 0x39c   :  { %v591_v45 = vadd.f32 %v583_v46, %v557_v42  ;;  %v617_v47 = vmul.f32 %v1536_v40, %v603_v44 }
 0x39e   :  { %v625_v52 = vadd.f32 %v617_v47, %v591_v45 }
 0x39f   :  { %v577_v56 = vpop.permute.xlu1 %576 }
 0x3a0   :  { %v635_v24 = vadd.f32 %v1543_v48, %v625_v52  ;;  %v587_v20 = vmul.f32 %v580_v9, %v577_v56 }
 0x3a1   :  { %v575_v57 = vpop.permute.xlu0 %574 }
 0x3a2   :  { %v586_v59 = vmul.f32 %v580_v9, %v575_v57  ;;  %v1547_v60 = vmax.f32 %v635_v24, 0.0  ;;  %v595_v42 = vadd.f32 %v587_v20, %v561_v30  ;;  %v1599_v24 = vstv %s1003_s16 }
 0x3a3   :  { %v609_v62 = vpop.permute.xlu2 %608  ;;  %v1601_v57 = vstv %s1002_s17 }
 0x3a4   :  { %v594_v55 = vadd.f32 %v586_v59, %v560_v58  ;;  %v620_v3 = vmul.f32 %v1536_v40, %v609_v62  ;;  %664 = vrot.lane.b32.xlu1 %v1547_v60, %s1044_s6  ;;  %v1603_v59 = vstv %s1004_s18 }
 0x3a6   :  { %v628_v49 = vadd.f32 %v620_v3, %v594_v55 }
 0x3a7   :  { %v601_v7 = vpop.permute.xlu1 %600 }
 0x3a8   :  { %v616_v61 = vmul.f32 %v1536_v40, %v601_v7  ;;  %v638_v8 = vadd.f32 %v1543_v48, %v628_v49  ;;  %v1613_v7 = vld [vmem:[%s1810_s1 + $0x6] ss:$0 sm:$0xff] }
 0x3a9   :  { %v599_v13 = vpop.permute.xlu0 %598 }
 0x3aa   :  { %v624_v17 = vadd.f32 %v616_v61, %v590_v51  ;;  %v615_v0 = vmul.f32 %v1536_v40, %v599_v13  ;;  %v1559_v2 = vmax.f32 %v638_v8, 0.0 }
 0x3ac   :  { %v623_v21 = vadd.f32 %v615_v0, %v589_v29  ;;  %670 = vrot.lane.b32.xlu1 %v1559_v2, %s1044_s6  ;;  %v634_v22 = vadd.f32 %v1543_v48, %v624_v17 }
 0x3ae   :  { %v642_v6 = vmax.f32 %v634_v22, 0.0  ;;  %v633_v16 = vadd.f32 %v1543_v48, %v623_v21 }
 0x3af   :  { %v607_v19 = vpop.permute.xlu1 %606 }
 0x3b0   :  { %v619_v15 = vmul.f32 %v1536_v40, %v607_v19  ;;  %662 = vrot.lane.b32.xlu0 %v642_v6, %s1044_s6  ;;  %v641_v39 = vmax.f32 %v633_v16, 0.0  ;;  %v652_v63 = vmul.f32 %v1601_v57, %v642_v6 }
 0x3b1   :  { %v605_v23 = vpop.permute.xlu0 %604 }
 0x3b2   :  { %v627_v31 = vadd.f32 %v619_v15, %v593_v11  ;;  %v618_v33 = vmul.f32 %v1536_v40, %v605_v23  ;;  %660 = vrot.lane.b32.xlu2 %v641_v39, %s1044_s6  ;;  %v651_v50 = vmul.f32 %v1601_v57, %v641_v39 }
 0x3b4   :  { %v626_v53 = vadd.f32 %v618_v33, %v592_v27  ;;  %694 = vrot.lane.b32.xlu1 %v641_v39, %s1041_s23  ;;  %v637_v28 = vadd.f32 %v1543_v48, %v627_v31 }
 0x3b6   :  { %v645_v32 = vmax.f32 %v637_v28, 0.0  ;;  %v636_v1 = vadd.f32 %v1543_v48, %v626_v53 }
 0x3b7   :  { %v613_v25 = vpop.permute.xlu1 %612 }
 0x3b8   :  { %v622_v37 = vmul.f32 %v1536_v40, %v613_v25  ;;  %668 = vrot.lane.b32.xlu0 %v645_v32, %s1044_s6  ;;  %v644_v36 = vmax.f32 %v636_v1, 0.0  ;;  %v655_v0 = vmul.f32 %v1601_v57, %v645_v32 }
 0x3b9   :  { %v611_v26 = vpop.permute.xlu0 %610 }
 0x3ba   :  { %v630_v46 = vadd.f32 %v622_v37, %v596_v35  ;;  %v621_v44 = vmul.f32 %v1536_v40, %v611_v26  ;;  %666 = vrot.lane.b32.xlu2 %v644_v36, %s1044_s6 }
 0x3bc   :  { %v629_v10 = vadd.f32 %v621_v44, %v595_v42  ;;  %700 = vrot.lane.b32.xlu1 %v644_v36, %s1041_s23  ;;  %v640_v9 = vadd.f32 %v1543_v48, %v630_v46  ;;  %v653_v44 = vmul.f32 %v1601_v57, %v1547_v60 }
 0x3be   :  { %v648_v45 = vmax.f32 %v640_v9, 0.0  ;;  %v639_v14 = vadd.f32 %v1543_v48, %v629_v10 }
 0x3c0   :  { %674 = vrot.lane.b32.xlu0 %v648_v45, %s1044_s6  ;;  %v647_v38 = vmax.f32 %v639_v14, 0.0  ;;  %v658_v34 = vmul.f32 %v1601_v57, %v648_v45 }
 0x3c2   :  { %672 = vrot.lane.b32.xlu2 %v647_v38, %s1044_s6  ;;  %v657_v1 = vmul.f32 %v1601_v57, %v647_v38 }
 0x3c4   :  { %706 = vrot.lane.b32.xlu1 %v647_v38, %s1041_s23 }
 0x3c8   :  { %698 = vrot.lane.b32.xlu0 %v1547_v60, %s1041_s23 }
 0x3ca   :  { %696 = vrot.lane.b32.xlu2 %v642_v6, %s1041_s23  ;;  %v654_v6 = vmul.f32 %v1601_v57, %v644_v36 }
 0x3d0   :  { %704 = vrot.lane.b32.xlu0 %v1559_v2, %s1041_s23 }
 0x3d2   :  { %702 = vrot.lane.b32.xlu2 %v645_v32, %s1041_s23 }
 0x3da   :  { %708 = vrot.lane.b32.xlu2 %v648_v45, %s1041_s23 }
 0x40c   :  { %v661_v40 = vpop.permute.xlu2 %660 }
 0x40d   :  { %v677_v62 = vmul.f32 %v1599_v24, %v661_v40 }
 0x40f   :  { %v685_v5 = vadd.f32 %v677_v62, %v651_v50  ;;  %v656_v62 = vmul.f32 %v1601_v57, %v1559_v2 }
 0x414   :  { %v667_v47 = vpop.permute.xlu2 %666 }
 0x415   :  { %v680_v18 = vmul.f32 %v1599_v24, %v667_v47 }
 0x416   :  { %v665_v48 = vpop.permute.xlu1 %664 }
 0x417   :  { %v688_v15 = vadd.f32 %v680_v18, %v654_v6  ;;  %v679_v36 = vmul.f32 %v1599_v24, %v665_v48 }
 0x419   :  { %v687_v14 = vadd.f32 %v679_v36, %v653_v44 }
 0x41c   :  { %v673_v52 = vpop.permute.xlu2 %672 }
 0x41d   :  { %v683_v53 = vmul.f32 %v1599_v24, %v673_v52 }
 0x41e   :  { %v1597_v56 = vpop.permute.xlu1 %670 }
 0x41f   :  { %v691_v26 = vadd.f32 %v683_v53, %v657_v1  ;;  %v682_v60 = vmul.f32 %v1599_v24, %v1597_v56 }
 0x422   :  { %v663_v58 = vpop.permute.xlu0 %662 }
 0x423   :  { %v678_v55 = vmul.f32 %v1599_v24, %v663_v58 }
 0x424   :  { %v697_v3 = vpop.permute.xlu2 %696 }
 0x425   :  { %v686_v41 = vadd.f32 %v678_v55, %v652_v63  ;;  %v712_v49 = vmul.f32 %v1603_v59, %v697_v3  ;;  %v690_v3 = vadd.f32 %v682_v60, %v656_v62 }
 0x426   :  { %v695_v51 = vpop.permute.xlu1 %694 }
 0x427   :  { %v720_v61 = vadd.f32 %v712_v49, %v686_v41  ;;  %v711_v8 = vmul.f32 %v1603_v59, %v695_v51  ;;  %v1685_v51 = vstv %s1006_s21 }
 0x429   :  { %v719_v13 = vadd.f32 %v711_v8, %v685_v5  ;;  %v730_v29 = vadd.f32 %v1613_v7, %v720_v61  ;;  %v1688_v8 = vstv %s1005_s22 }
 0x42a   :  { %v669_v17 = vpop.permute.xlu0 %668 }
 0x42b   :  { %v681_v21 = vmul.f32 %v1599_v24, %v669_v17  ;;  %v1620_v22 = vmax.f32 %v730_v29, 0.0  ;;  %v729_v43 = vadd.f32 %v1613_v7, %v719_v13  ;;  %v1690_v13 = vstv %s1007_s3 }
 0x42c   :  { %v703_v54 = vpop.permute.xlu2 %702 }
 0x42d   :  { %v689_v16 = vadd.f32 %v681_v21, %v655_v0  ;;  %v715_v19 = vmul.f32 %v1603_v59, %v703_v54  ;;  %758 = vrot.lane.b32.xlu1 %v1620_v22, %s1044_s6  ;;  %v1627_v11 = vmax.f32 %v729_v43, 0.0  ;;  %v1698_v21 = vld [vmem:[%s1810_s1 + $0x7] ss:$0 sm:$0xff]  ;;  %s1045_s1 = smov 126  }
 0x42e   :  { %v701_v12 = vpop.permute.xlu1 %700 }
 0x42f   :  { %v723_v39 = vadd.f32 %v715_v19, %v689_v16  ;;  %v714_v23 = vmul.f32 %v1603_v59, %v701_v12  ;;  %756 = vrot.lane.b32.xlu0 %v1627_v11, %s1044_s6  ;;  %v747_v29 = vmul.f32 %v1688_v8, %v1627_v11 }
 0x431   :  { %v722_v27 = vadd.f32 %v714_v23, %v688_v15  ;;  %v733_v31 = vadd.f32 %v1613_v7, %v723_v39 }
 0x432   :  { %v675_v33 = vpop.permute.xlu0 %674 }
 0x433   :  { %v684_v28 = vmul.f32 %v1599_v24, %v675_v33  ;;  %v1636_v4 = vmax.f32 %v733_v31, 0.0  ;;  %v732_v20 = vadd.f32 %v1613_v7, %v722_v27 }
 0x434   :  { %v709_v32 = vpop.permute.xlu2 %708 }
 0x435   :  { %v692_v25 = vadd.f32 %v684_v28, %v658_v34  ;;  %v718_v35 = vmul.f32 %v1603_v59, %v709_v32  ;;  %764 = vrot.lane.b32.xlu1 %v1636_v4, %s1044_s6  ;;  %v1643_v30 = vmax.f32 %v732_v20, 0.0  ;;  %v748_v34 = vmul.f32 %v1688_v8, %v1620_v22 }
 0x436   :  { %v707_v37 = vpop.permute.xlu1 %706 }
 0x437   :  { %v726_v42 = vadd.f32 %v718_v35, %v692_v25  ;;  %v717_v46 = vmul.f32 %v1603_v59, %v707_v37  ;;  %762 = vrot.lane.b32.xlu0 %v1643_v30, %s1044_s6 }
 0x439   :  { %v725_v10 = vadd.f32 %v717_v46, %v691_v26  ;;  %v736_v9 = vadd.f32 %v1613_v7, %v726_v42 }
 0x43a   :  { %v699_v45 = vpop.permute.xlu0 %698 }
 0x43b   :  { %v713_v38 = vmul.f32 %v1603_v59, %v699_v45  ;;  %v1653_v40 = vmax.f32 %v736_v9, 0.0  ;;  %v735_v47 = vadd.f32 %v1613_v7, %v725_v10 }
 0x43d   :  { %v721_v48 = vadd.f32 %v713_v38, %v687_v14  ;;  %770 = vrot.lane.b32.xlu1 %v1653_v40, %s1044_s6  ;;  %v1658_v52 = vmax.f32 %v735_v47, 0.0 }
 0x43f   :  { %768 = vrot.lane.b32.xlu0 %v1658_v52, %s1044_s6  ;;  %v731_v58 = vadd.f32 %v1613_v7, %v721_v48  ;;  %v753_v26 = vmul.f32 %v1688_v8, %v1658_v52 }
 0x441   :  { %v739_v63 = vmax.f32 %v731_v58, 0.0 }
 0x442   :  { %v705_v55 = vpop.permute.xlu0 %704 }
 0x443   :  { %v716_v50 = vmul.f32 %v1603_v59, %v705_v55  ;;  %760 = vrot.lane.b32.xlu2 %v739_v63, %s1044_s6  ;;  %v749_v27 = vmul.f32 %v1688_v8, %v739_v63 }
 0x445   :  { %v724_v41 = vadd.f32 %v716_v50, %v690_v3  ;;  %794 = vrot.lane.b32.xlu1 %v739_v63, %s1041_s23 }
 0x447   :  { %792 = vrot.lane.b32.xlu0 %v1620_v22, %s1041_s23  ;;  %v734_v56 = vadd.f32 %v1613_v7, %v724_v41 }
 0x449   :  { %v742_v24 = vmax.f32 %v734_v56, 0.0 }
 0x44b   :  { %766 = vrot.lane.b32.xlu2 %v742_v24, %s1044_s6  ;;  %v752_v10 = vmul.f32 %v1688_v8, %v742_v24 }
 0x44d   :  { %800 = vrot.lane.b32.xlu1 %v742_v24, %s1041_s23 }
 0x44f   :  { %798 = vrot.lane.b32.xlu0 %v1636_v4, %s1041_s23 }
 0x453   :  { %790 = vrot.lane.b32.xlu2 %v1627_v11, %s1041_s23  ;;  %v750_v11 = vmul.f32 %v1688_v8, %v1643_v30 }
 0x457   :  { %804 = vrot.lane.b32.xlu0 %v1653_v40, %s1041_s23 }
 0x45b   :  { %796 = vrot.lane.b32.xlu2 %v1643_v30, %s1041_s23 }
 0x463   :  { %802 = vrot.lane.b32.xlu2 %v1658_v52, %s1041_s23  ;;  %v751_v52 = vmul.f32 %v1688_v8, %v1636_v4 }
 0x49d   :  { %v761_v2 = vpop.permute.xlu2 %760 }
 0x49e   :  { %v775_v12 = vmul.f32 %v1685_v51, %v761_v2 }
 0x49f   :  { %v759_v57 = vpop.permute.xlu1 %758 }
 0x4a0   :  { %v774_v39 = vmul.f32 %v1685_v51, %v759_v57  ;;  %v783_v28 = vadd.f32 %v775_v12, %v749_v27 }
 0x4a1   :  { %v757_v59 = vpop.permute.xlu0 %756 }
 0x4a2   :  { %v773_v61 = vmul.f32 %v1685_v51, %v757_v59  ;;  %v782_v1 = vadd.f32 %v774_v39, %v748_v34 }
 0x4a4   :  { %v781_v0 = vadd.f32 %v773_v61, %v747_v29 }
 0x4a5   :  { %v767_v49 = vpop.permute.xlu2 %766 }
 0x4a6   :  { %v778_v22 = vmul.f32 %v1685_v51, %v767_v49 }
 0x4a7   :  { %v765_v7 = vpop.permute.xlu1 %764 }
 0x4a8   :  { %v777_v9 = vmul.f32 %v1685_v51, %v765_v7  ;;  %v786_v58 = vadd.f32 %v778_v22, %v752_v10 }
 0x4a9   :  { %v763_v5 = vpop.permute.xlu0 %762 }
 0x4aa   :  { %v776_v16 = vmul.f32 %v1685_v51, %v763_v5  ;;  %v785_v50 = vadd.f32 %v777_v9, %v751_v52  ;;  %v754_v5 = vmul.f32 %v1688_v8, %v1653_v40 }
 0x4ac   :  { %v784_v31 = vadd.f32 %v776_v16, %v750_v11 }
 0x4ad   :  { %v791_v17 = vpop.permute.xlu2 %790 }
 0x4ae   :  { %v807_v18 = vmul.f32 %v1690_v13, %v791_v17 }
 0x4af   :  { %v771_v43 = vpop.permute.xlu1 %770 }
 0x4b0   :  { %v815_v54 = vadd.f32 %v807_v18, %v781_v0  ;;  %v780_v59 = vmul.f32 %v1685_v51, %v771_v43 }
 0x4b1   :  { %v769_v6 = vpop.permute.xlu0 %768 }
 0x4b2   :  { %v1702_v19 = vadd.f32 %v1698_v21, %v815_v54  ;;  %v779_v35 = vmul.f32 %v1685_v51, %v769_v6  ;;  %v788_v17 = vadd.f32 %v780_v59, %v754_v5  ;;  %v1023_v54 = vld [vmem:[%s1811_s2] ss:$0 sm:$0xff] }
 0x4b4   :  { %v833_v15 = vmax.f32 %v1702_v19, 0.0  ;;  %v787_v14 = vadd.f32 %v779_v35, %v753_v26 }
 0x4b5   :  { %v797_v23 = vpop.permute.xlu2 %796 }
 0x4b6   :  { %v810_v33 = vmul.f32 %v1690_v13, %v797_v23  ;;  %841 = vrot.lane.b32.xlu1 %v833_v15, %s1045_s1 }
 0x4b7   :  { %v795_v53 = vpop.permute.xlu1 %794 }
 0x4b8   :  { %v818_v20 = vadd.f32 %v810_v33, %v784_v31  ;;  %v809_v32 = vmul.f32 %v1690_v13, %v795_v53 }
 0x4b9   :  { %v793_v25 = vpop.permute.xlu0 %792 }
 0x4ba   :  { %v817_v30 = vadd.f32 %v809_v32, %v783_v28  ;;  %v808_v37 = vmul.f32 %v1690_v13, %v793_v25  ;;  %v1720_v36 = vadd.f32 %v1698_v21, %v818_v20 }
 0x4bc   :  { %v816_v42 = vadd.f32 %v808_v37, %v782_v1  ;;  %v836_v46 = vmax.f32 %v1720_v36, 0.0  ;;  %v827_v44 = vadd.f32 %v1698_v21, %v817_v30  ;;  %v1024_v30 = vld [vmem:[%s1811_s2 + $0x1] ss:$0 sm:$0xff] }
 0x4bd   :  { %v803_v45 = vpop.permute.xlu2 %802 }
 0x4be   :  { %v813_v38 = vmul.f32 %v1690_v13, %v803_v45  ;;  %847 = vrot.lane.b32.xlu1 %v836_v46, %s1045_s1  ;;  %v835_v47 = vmax.f32 %v827_v44, 0.0  ;;  %v826_v48 = vadd.f32 %v1698_v21, %v816_v42  ;;  %v1025_v44 = vld [vmem:[%s1811_s2 + $0x2] ss:$0 sm:$0xff]  ;;  %s984_s2 = sld [smem:[#allocation2 + $0x18]] }
 0x4bf   :  { %v801_v60 = vpop.permute.xlu1 %800 }
 0x4c0   :  { %v821_v62 = vadd.f32 %v813_v38, %v787_v14  ;;  %v812_v63 = vmul.f32 %v1690_v13, %v801_v60  ;;  %845 = vrot.lane.b32.xlu0 %v835_v47, %s1045_s1  ;;  %v834_v55 = vmax.f32 %v826_v48, 0.0 }
 0x4c1   :  { %v799_v3 = vpop.permute.xlu0 %798 }
 0x4c2   :  { %v820_v41 = vadd.f32 %v812_v63, %v786_v58  ;;  %v811_v56 = vmul.f32 %v1690_v13, %v799_v3  ;;  %843 = vrot.lane.b32.xlu2 %v834_v55, %s1045_s1  ;;  %v831_v24 = vadd.f32 %v1698_v21, %v821_v62 }
 0x4c4   :  { %v819_v2 = vadd.f32 %v811_v56, %v785_v50  ;;  %v839_v57 = vmax.f32 %v831_v24, 0.0  ;;  %v830_v4 = vadd.f32 %v1698_v21, %v820_v41  ;;  %v961_v5 = vstv %s984_s2 }
 0x4c6   :  { %853 = vrot.lane.b32.xlu1 %v839_v57, %s1045_s1  ;;  %v838_v49 = vmax.f32 %v830_v4, 0.0  ;;  %v829_v7 = vadd.f32 %v1698_v21, %v819_v2 }
 0x4c8   :  { %851 = vrot.lane.b32.xlu0 %v838_v49, %s1045_s1  ;;  %v837_v61 = vmax.f32 %v829_v7, 0.0 }
 0x4c9   :  { %v805_v29 = vpop.permute.xlu0 %804 }
 0x4ca   :  { %v814_v0 = vmul.f32 %v1690_v13, %v805_v29  ;;  %849 = vrot.lane.b32.xlu2 %v837_v61, %s1045_s1 }
 0x4cc   :  { %v822_v18 = vadd.f32 %v814_v0, %v788_v17 }
 0x4ce   :  { %v832_v51 = vadd.f32 %v1698_v21, %v822_v18 }
 0x4d0   :  { %v840_v43 = vmax.f32 %v832_v51, 0.0 }
 0x4d2   :  { %855 = vrot.lane.b32.xlu2 %v840_v43, %s1045_s1 }
 0x51c   :  { %v844_v40 = vpop.permute.xlu2 %843 }
 0x51d   :  { %v858_v8 = vmax.f32 %v834_v55, %v844_v40 }
 0x51f   :  { %v868_v6 = vmul.f32 %v1023_v54, %v858_v8  ;;  %v920_v38 = vmul.f32 %v1025_v44, %v858_v8 }
 0x521   :  { %877 = vadd.xlane.f32.xlu1 %v868_v6 }
 0x524   :  { %v850_v12 = vpop.permute.xlu2 %849 }
 0x525   :  { %v861_v39 = vmax.f32 %v837_v61, %v850_v12 }
 0x527   :  { %v871_v27 = vmul.f32 %v1023_v54, %v861_v39  ;;  %v897_v45 = vmul.f32 %v1024_v30, %v861_v39  ;;  %v923_v52 = vmul.f32 %v1025_v44, %v861_v39 }
 0x528   :  { %v842_v16 = vpop.permute.xlu1 %841 }
 0x529   :  { %v857_v13 = vmax.f32 %v833_v15, %v842_v16 }
 0x52b   :  { %v867_v11 = vmul.f32 %v1023_v54, %v857_v13  ;;  %v893_v36 = vmul.f32 %v1024_v30, %v857_v13  ;;  %v919_v10 = vmul.f32 %v1025_v44, %v857_v13 }
 0x52c   :  { %v856_v31 = vpop.permute.xlu2 %855 }
 0x52d   :  { %875 = vadd.xlane.f32.xlu0 %v867_v11  ;;  %v864_v53 = vmax.f32 %v840_v43, %v856_v31 }
 0x52f   :  { %v874_v1 = vmul.f32 %v1023_v54, %v864_v53  ;;  %v926_v58 = vmul.f32 %v1025_v44, %v864_v53 }
 0x530   :  { %v848_v33 = vpop.permute.xlu1 %847 }
 0x531   :  { %v860_v28 = vmax.f32 %v836_v46, %v848_v33  ;;  %v894_v46 = vmul.f32 %v1024_v30, %v858_v8 }
 0x532   :  { %v846_v21 = vpop.permute.xlu0 %845 }
 0x533   :  { %v859_v23 = vmax.f32 %v835_v47, %v846_v21  ;;  %v870_v15 = vmul.f32 %v1023_v54, %v860_v28  ;;  %v896_v42 = vmul.f32 %v1024_v30, %v860_v28  ;;  %v922_v14 = vmul.f32 %v1025_v44, %v860_v28 }
 0x534   :  { %v900_v47 = vmul.f32 %v1024_v30, %v864_v53 }
 0x535   :  { %883 = vadd.xlane.f32.xlu0 %v871_v27  ;;  %v869_v34 = vmul.f32 %v1023_v54, %v859_v23  ;;  %v895_v37 = vmul.f32 %v1024_v30, %v859_v23  ;;  %v921_v60 = vmul.f32 %v1025_v44, %v859_v23 }
 0x537   :  { %879 = vadd.xlane.f32.xlu2 %v869_v34 }
 0x538   :  { %v854_v25 = vpop.permute.xlu1 %853 }
 0x539   :  { %v863_v35 = vmax.f32 %v839_v57, %v854_v25 }
 0x53a   :  { %v852_v20 = vpop.permute.xlu0 %851 }
 0x53b   :  { %v862_v32 = vmax.f32 %v838_v49, %v852_v20  ;;  %v873_v26 = vmul.f32 %v1023_v54, %v863_v35  ;;  %v899_v9 = vmul.f32 %v1024_v30, %v863_v35  ;;  %v925_v48 = vmul.f32 %v1025_v44, %v863_v35 }
 0x53d   :  { %889 = vadd.xlane.f32.xlu0 %v874_v1  ;;  %v872_v19 = vmul.f32 %v1023_v54, %v862_v32  ;;  %v898_v22 = vmul.f32 %v1024_v30, %v862_v32  ;;  %v924_v62 = vmul.f32 %v1025_v44, %v862_v32 }
 0x53f   :  { %885 = vadd.xlane.f32.xlu1 %v872_v19  ;;  %881 = vadd.xlane.f32.xlu2 %v870_v15 }
 0x545   :  { %905 = vadd.xlane.f32.xlu0 %v895_v37 }
 0x547   :  { %901 = vadd.xlane.f32.xlu1 %v893_v36  ;;  %887 = vadd.xlane.f32.xlu2 %v873_v26 }
 0x54d   :  { %911 = vadd.xlane.f32.xlu0 %v898_v22 }
 0x54f   :  { %907 = vadd.xlane.f32.xlu1 %v896_v42  ;;  %903 = vadd.xlane.f32.xlu2 %v894_v46 }
 0x555   :  { %927 = vadd.xlane.f32.xlu0 %v919_v10 }
 0x557   :  { %913 = vadd.xlane.f32.xlu1 %v899_v9  ;;  %909 = vadd.xlane.f32.xlu2 %v897_v45 }
 0x55d   :  { %933 = vadd.xlane.f32.xlu0 %v922_v14 }
 0x55f   :  { %929 = vadd.xlane.f32.xlu1 %v920_v38  ;;  %915 = vadd.xlane.f32.xlu2 %v900_v47 }
 0x565   :  { %939 = vadd.xlane.f32.xlu0 %v925_v48 }
 0x567   :  { %935 = vadd.xlane.f32.xlu1 %v923_v52  ;;  %931 = vadd.xlane.f32.xlu2 %v921_v60 }
 0x56f   :  { %941 = vadd.xlane.f32.xlu1 %v926_v58  ;;  %937 = vadd.xlane.f32.xlu2 %v924_v62 }
 0x594   :  { %v878_v3 = vpop.xlane.xlu1 %877 }
 0x5a0   :  { %v876_v63 = vpop.xlane.xlu0 %875 }
 0x5a8   :  { %v884_v55 = vpop.xlane.xlu0 %883 }
 0x5aa   :  { %v880_v50 = vpop.xlane.xlu2 %879 }
 0x5b0   :  { %v890_v41 = vpop.xlane.xlu0 %889 }
 0x5b2   :  { %v882_v56 = vpop.xlane.xlu2 %881  ;;  %v886_v24 = vpop.xlane.xlu1 %885 }
 0x5b8   :  { %v906_v2 = vpop.xlane.xlu0 %905 }
 0x5b9   :  { %v946_v27 = vsel %vm943_vm1, %v880_v50, %v906_v2 }
 0x5ba   :  { %v888_v57 = vpop.xlane.xlu2 %887  ;;  %v902_v4 = vpop.xlane.xlu1 %901 }
 0x5bb   :  { %v944_v61 = vsel %vm943_vm1, %v876_v63, %v902_v4 }
 0x5c0   :  { %v912_v59 = vpop.xlane.xlu0 %911 }
 0x5c1   :  { %v949_v19 = vsel %vm943_vm1, %v886_v24, %v912_v59 }
 0x5c2   :  { %v904_v49 = vpop.xlane.xlu2 %903  ;;  %v908_v7 = vpop.xlane.xlu1 %907 }
 0x5c3   :  { %v947_v43 = vsel %vm943_vm1, %v882_v56, %v908_v7  ;;  %v945_v8 = vsel %vm943_vm1, %v878_v3, %v904_v49 }
 0x5c8   :  { %v928_v29 = vpop.xlane.xlu0 %927 }
 0x5c9   :  { %v953_v17 = vsel %vm952_vm0, %v944_v61, %v928_v29 }
 0x5ca   :  { %v962_v0 = vadd.f32 %v961_v5, %v953_v17  ;;  %v910_v18 = vpop.xlane.xlu2 %909  ;;  %v914_v51 = vpop.xlane.xlu1 %913 }
 0x5cb   :  { %v950_v39 = vsel %vm943_vm1, %v888_v57, %v914_v51  ;;  %v948_v31 = vsel %vm943_vm1, %v884_v55, %v910_v18 }
 0x5cc   :  { %971 = vst.msk [vmem:[%s1813_s4] sm:$0xff] %vm970_vm2, %v962_v0 }
 0x5d0   :  { %v934_v54 = vpop.xlane.xlu0 %933 }
 0x5d1   :  { %v956_v40 = vsel %vm952_vm0, %v947_v43, %v934_v54 }
 0x5d2   :  { %v965_v6 = vadd.f32 %v961_v5, %v956_v40  ;;  %v916_v16 = vpop.xlane.xlu2 %915  ;;  %v930_v13 = vpop.xlane.xlu1 %929 }
 0x5d3   :  { %v954_v12 = vsel %vm952_vm0, %v945_v8, %v930_v13  ;;  %v951_v15 = vsel %vm943_vm1, %v890_v41, %v916_v16 }
 0x5d4   :  { %974 = vst.msk [vmem:[%s1813_s4 + $0x18] sm:$0xff] %vm970_vm2, %v965_v6  ;;  %v963_v11 = vadd.f32 %v961_v5, %v954_v12 }
 0x5d6   :  { %972 = vst.msk [vmem:[%s1813_s4 + $0x8] sm:$0xff] %vm970_vm2, %v963_v11 }
 0x5d8   :  { %v940_v21 = vpop.xlane.xlu0 %939 }
 0x5d9   :  { %v959_v23 = vsel %vm952_vm0, %v950_v39, %v940_v21 }
 0x5da   :  { %v968_v33 = vadd.f32 %v961_v5, %v959_v23  ;;  %v932_v34 = vpop.xlane.xlu2 %931  ;;  %v936_v53 = vpop.xlane.xlu1 %935 }
 0x5db   :  { %v955_v28 = vsel %vm952_vm0, %v946_v27, %v932_v34  ;;  %v957_v20 = vsel %vm952_vm0, %v948_v31, %v936_v53 }
 0x5dc   :  { %977 = vst.msk [vmem:[%s1813_s4 + $0x30] sm:$0xff] %vm970_vm2, %v968_v33  ;;  %v964_v32 = vadd.f32 %v961_v5, %v955_v28  ;;  %v966_v1 = vadd.f32 %v961_v5, %v957_v20 }
 0x5de   :  { %973 = vst.msk [vmem:[%s1813_s4 + $0x10] sm:$0xff] %vm970_vm2, %v964_v32 }
 0x5df   :  { %975 = vst.msk [vmem:[%s1813_s4 + $0x20] sm:$0xff] %vm970_vm2, %v966_v1 }
 0x5e2   :  { %v938_v25 = vpop.xlane.xlu2 %937  ;;  %v942_v35 = vpop.xlane.xlu1 %941 }
 0x5e3   :  { %v958_v30 = vsel %vm952_vm0, %v949_v19, %v938_v25  ;;  %v960_v37 = vsel %vm952_vm0, %v951_v15, %v942_v35 }
 0x5e4   :  { %v967_v36 = vadd.f32 %v961_v5, %v958_v30  ;;  %v969_v26 = vadd.f32 %v961_v5, %v960_v37 }
 0x5e6   :  { %976 = vst.msk [vmem:[%s1813_s4 + $0x28] sm:$0xff] %vm970_vm2, %v967_v36 }
 0x5e7   :  { %978 = vst.msk [vmem:[%s1813_s4 + $0x38] sm:$0xff] %vm970_vm2, %v969_v26 }
 0x5e8   :  { %983 = vsyncpa [#allocation3], 1 }

</bundles_post_ra>
